<compile_context>
chip_gen: v5e
topology: v5e:2x2
jax: 0.10.0
libtpu: 0.0.40
codegen_flags: <defaults>
</compile_context>

<pallas_src>
import jax
import jax.numpy as jnp
from jax import lax
from jax.experimental import pallas as pl
from jax.experimental.pallas import tpu as pltpu

# ------------------------- model hyper-parameters ---------------------------
B = 2             # batch
N = 8             # sequence length
DIM = 32          # model dim
DEPTH = 2
HEADS = 4
DIM_HEAD = 8
INNER = HEADS * DIM_HEAD        # 32
MLP_DIM = 64
EPS = 1e-5

BN = B * N
SCALE = DIM_HEAD ** (-0.5)

# ----------------- packed parameter slab layout (per layer) -----------------
# One lane-dense (SLAB_ROWS, 128) f32 slab per layer:
#   rows [  0,  32) cols [ 0,  96) : W_qkv   (DIM, 3*INNER)
#   rows [  0,  32) cols [96, 128) : W_out   (INNER, DIM)
#   rows [ 32,  64) cols [ 0,  64) : W_mlp1  (DIM, MLP_DIM)
#   rows [ 64, 128) cols [ 0,  32) : W_mlp2  (MLP_DIM, DIM)
#   rows [128, 136) cols [ 0,   *) : LN gammas/betas and biases (one per row)
SLAB_COLS = 128
VROW = 2 * DIM + MLP_DIM          # 128 : first vector row
SLAB_ROWS = VROW + 8              # 136
R_LN1G, R_LN1B, R_BOUT, R_LN2G, R_LN2B, R_B1, R_B2 = range(VROW, VROW + 7)


# ------------------------------ shared math ----------------------------------
def _layernorm(x, g, b):
    # nn.LayerNorm: biased variance over the last dim, eps=1e-5 inside rsqrt.
    mu = jnp.mean(x, axis=-1, keepdims=True)
    var = jnp.mean((x - mu) ** 2, axis=-1, keepdims=True)
    return (x - mu) * lax.rsqrt(var + EPS) * g + b


def _erf(x):
    # f32-accurate erf built only from ops with guaranteed Mosaic lowerings
    # (abs / exp / where / VPU math). Max abs error ~1.5e-7.
    a = jnp.abs(x)
    t = 1.0 / (1.0 + 0.3275911 * a)
    poly = ((((1.061405429 * t - 1.453152027) * t + 1.421413741) * t
             - 0.284496736) * t + 0.254829592) * t
    e = 1.0 - poly * jnp.exp(-a * a)
    return jnp.where(x < 0, -e, e)


def _gelu_exact(x):
    # nn.GELU() default = exact erf formulation.
    return 0.5 * x * (1.0 + _erf(x * 0.7071067811865476))


def _heads_to_batch(t):
    # (B*N, HEADS*DIM_HEAD) -> (HEADS*B, N, DIM_HEAD)
    # i.e. rearrange(t, 'b n (h d) -> (h b) n d')
    parts = [t[:, h * DIM_HEAD:(h + 1) * DIM_HEAD].reshape(B, N, DIM_HEAD)
             for h in range(HEADS)]
    return jnp.concatenate(parts, axis=0)


def _batch_to_heads(t):
    # (HEADS*B, N, DIM_HEAD) -> (B*N, HEADS*DIM_HEAD)
    # i.e. rearrange(t, '(h b) n d -> b n (h d)')
    parts = [t[h * B:(h + 1) * B].reshape(BN, DIM_HEAD) for h in range(HEADS)]
    return jnp.concatenate(parts, axis=-1)


# --------------------------------- kernel ------------------------------------
def transformer_kernel(x_ref, w_ref, o_ref):
    x = x_ref[...]                                   # (BN, DIM), VMEM-resident

    for l in range(DEPTH):                           # static unroll over depth
        # ---- per-layer parameter views (static slices of the VMEM slab) ----
        w_qkv = w_ref[l, 0:DIM, 0:3 * INNER]                       # (32, 96)
        w_out = w_ref[l, 0:DIM, 3 * INNER:3 * INNER + DIM]         # (32, 32)
        w_1   = w_ref[l, DIM:2 * DIM, 0:MLP_DIM]                   # (32, 64)
        w_2   = w_ref[l, 2 * DIM:2 * DIM + MLP_DIM, 0:DIM]         # (64, 32)
        ln1_g = w_ref[l, R_LN1G:R_LN1G + 1, 0:DIM]                 # (1, 32)
        ln1_b = w_ref[l, R_LN1B:R_LN1B + 1, 0:DIM]
        bout  = w_ref[l, R_BOUT:R_BOUT + 1, 0:DIM]
        ln2_g = w_ref[l, R_LN2G:R_LN2G + 1, 0:DIM]
        ln2_b = w_ref[l, R_LN2B:R_LN2B + 1, 0:DIM]
        b1    = w_ref[l, R_B1:R_B1 + 1, 0:MLP_DIM]                 # (1, 64)
        b2    = w_ref[l, R_B2:R_B2 + 1, 0:DIM]                     # (1, 32)

        # ---- PreNorm + multi-head self-attention ---------------------------
        xn = _layernorm(x, ln1_g, ln1_b)                           # (BN, 32)

        # one fused QKV projection per layer (review item 1)
        qkv = jnp.dot(xn, w_qkv, preferred_element_type=jnp.float32)  # (BN, 96)
        q = _heads_to_batch(qkv[:, 0:INNER])                       # (H*B, N, Dh)
        k = _heads_to_batch(qkv[:, INNER:2 * INNER])
        v = _heads_to_batch(qkv[:, 2 * INNER:3 * INNER])

        # scores of all heads/batches at once -> one softmax per layer (item 3)
        dots = jnp.einsum("znd,zmd->znm", q, k,
                          preferred_element_type=jnp.float32) * SCALE
        dots = dots - jnp.max(dots, axis=-1, keepdims=True)
        e = jnp.exp(dots)
        attn = e * pl.reciprocal(jnp.sum(e, axis=-1, keepdims=True),
                                 approx=True)                      # EUP slot
        o_h = jnp.einsum("znm,zmd->znd", attn, v,
                         preferred_element_type=jnp.float32)       # (H*B, N, Dh)

        # one fused output projection on the concatenated heads (item 2)
        o_cat = _batch_to_heads(o_h)                               # (BN, 32)
        attn_out = jnp.dot(o_cat, w_out,
                           preferred_element_type=jnp.float32) + bout
        x = x + attn_out                                           # residual 1

        # ---- PreNorm + FeedForward ------------------------------------------
        xn2 = _layernorm(x, ln2_g, ln2_b)
        h1 = _gelu_exact(jnp.dot(xn2, w_1,
                                 preferred_element_type=jnp.float32) + b1)
        h2 = jnp.dot(h1, w_2, preferred_element_type=jnp.float32) + b2
        x = x + h2                                                 # residual 2

    o_ref[...] = x


def transformer_forward(x, w_slab):
    """Run the full DEPTH-layer transformer in one gridless pallas_call."""
    Bv, Nv, Dv = x.shape
    x_flat = x.reshape(Bv * Nv, Dv)
    vmem = pl.BlockSpec(memory_space=pltpu.MemorySpace.VMEM)
    out = pl.pallas_call(
        transformer_kernel,
        out_shape=jax.ShapeDtypeStruct((Bv * Nv, Dv), jnp.float32),
        in_specs=[vmem, vmem],
        out_specs=vmem,
    )(x_flat, w_slab)
    return out.reshape(Bv, Nv, Dv)


# ----------------------------- parameter handling ----------------------------
def init_params(key):
    """Deterministic synthetic weights matching the PyTorch module's shapes.

    nn.Linear stores W as (out, in) and computes y = x @ W.T + b; weights are
    kept here in the pre-transposed (in, out) form so every matmul is y = x @ W.
    """
    layer_params = []
    for _ in range(DEPTH):
        keys = jax.random.split(key, 8)
        key = keys[0]
        layer_params.append({
            "ln1_g": jnp.ones((DIM,), jnp.float32),
            "ln1_b": jnp.zeros((DIM,), jnp.float32),
            "wqkv": 0.05 * jax.random.normal(keys[1], (DIM, 3 * INNER), jnp.float32),
            "wout": 0.05 * jax.random.normal(keys[2], (INNER, DIM), jnp.float32),
            "bout": 0.05 * jax.random.normal(keys[3], (DIM,), jnp.float32),
            "ln2_g": jnp.ones((DIM,), jnp.float32),
            "ln2_b": jnp.zeros((DIM,), jnp.float32),
            "w1": 0.05 * jax.random.normal(keys[4], (DIM, MLP_DIM), jnp.float32),
            "b1": 0.05 * jax.random.normal(keys[5], (MLP_DIM,), jnp.float32),
            "w2": 0.05 * jax.random.normal(keys[6], (MLP_DIM, DIM), jnp.float32),
            "b2": 0.05 * jax.random.normal(keys[7], (DIM,), jnp.float32),
        })
    return layer_params


def pack_params(layer_params):
    """Pack every per-layer tensor into one lane-dense (DEPTH,136,128) slab."""
    slabs = []
    for p in layer_params:
        s = jnp.zeros((SLAB_ROWS, SLAB_COLS), jnp.float32)
        s = s.at[0:DIM, 0:3 * INNER].set(p["wqkv"])
        s = s.at[0:DIM, 3 * INNER:3 * INNER + DIM].set(p["wout"])
        s = s.at[DIM:2 * DIM, 0:MLP_DIM].set(p["w1"])
        s = s.at[2 * DIM:2 * DIM + MLP_DIM, 0:DIM].set(p["w2"])
        s = s.at[R_LN1G, 0:DIM].set(p["ln1_g"])
        s = s.at[R_LN1B, 0:DIM].set(p["ln1_b"])
        s = s.at[R_BOUT, 0:DIM].set(p["bout"])
        s = s.at[R_LN2G, 0:DIM].set(p["ln2_g"])
        s = s.at[R_LN2B, 0:DIM].set(p["ln2_b"])
        s = s.at[R_B1, 0:MLP_DIM].set(p["b1"])
        s = s.at[R_B2, 0:DIM].set(p["b2"])
        slabs.append(s)
    return jnp.stack(slabs)                          # (DEPTH, 136, 128)


# ----------------------------- plain-JAX reference ---------------------------
def transformer_reference(x, layer_params):
    """Straightforward JAX port of the PyTorch forward (eval mode)."""
    Bv, Nv, _ = x.shape
    for p in layer_params:
        xn = _layernorm(x, p["ln1_g"], p["ln1_b"])
        qkv = xn @ p["wqkv"]
        q, k, v = jnp.split(qkv, 3, axis=-1)
        split = lambda t: t.reshape(Bv, Nv, HEADS, DIM_HEAD).transpose(0, 2, 1, 3)
        q, k, v = split(q), split(k), split(v)
        dots = jnp.einsum("bhnd,bhmd->bhnm", q, k) * SCALE
        attn = jax.nn.softmax(dots, axis=-1)
        out = jnp.einsum("bhnm,bhmd->bhnd", attn, v)
        out = out.transpose(0, 2, 1, 3).reshape(Bv, Nv, INNER)
        x = x + out @ p["wout"] + p["bout"]
        xn2 = _layernorm(x, p["ln2_g"], p["ln2_b"])
        h = jax.nn.gelu(xn2 @ p["w1"] + p["b1"], approximate=False)
        x = x + h @ p["w2"] + p["b2"]
    return x


if __name__ == "__main__":
    key = jax.random.PRNGKey(0)
    k_x, k_p = jax.random.split(key)
    x = jax.random.normal(k_x, (B, N, DIM), jnp.float32)
    layer_params = init_params(k_p)
    w_slab = pack_params(layer_params)

    out = transformer_forward(x, w_slab)
    out = jax.block_until_ready(out)
    assert out.shape == (B, N, DIM)
    assert bool(jnp.all(jnp.isfinite(out)))

    # Loose self-check vs the plain-JAX reference (differences come only from
    # MXU default matmul precision and the approximate softmax reciprocal).
    ref = transformer_reference(x, layer_params)
    err = float(jnp.max(jnp.abs(out - ref)))
    assert err < 5e-2, f"kernel/reference mismatch: max abs err = {err}"

    print("KERNEL_OK")
</pallas_src>

<mosaic_0001>
module attributes {stable_mosaic.version = 11 : i64} {
  func.func @transformer_kernel(%arg0: memref<16x32xf32, #tpu.memory_space<vmem>>, %arg1: memref<2x136x128xf32, #tpu.memory_space<vmem>>, %arg2: memref<16x32xf32, #tpu.memory_space<vmem>>) attributes {dimension_semantics = [], scalar_prefetch = 0 : i64, scratch_operands = 0 : i64, tpu.core_type = #tpu.core_type<tc>} {
    %c0 = arith.constant 0 : index
    %c0_0 = arith.constant 0 : index
    %0 = vector.load %arg0[%c0, %c0_0] : memref<16x32xf32, #tpu.memory_space<vmem>>, vector<16x32xf32>
    %c0_1 = arith.constant 0 : index
    %c0_2 = arith.constant 0 : index
    %c0_3 = arith.constant 0 : index
    %1 = vector.load %arg1[%c0_1, %c0_2, %c0_3] : memref<2x136x128xf32, #tpu.memory_space<vmem>>, vector<1x32x96xf32>
    %2 = vector.shape_cast %1 : vector<1x32x96xf32> to vector<32x96xf32>
    %c0_4 = arith.constant 0 : index
    %c0_5 = arith.constant 0 : index
    %c96 = arith.constant 96 : index
    %3 = vector.load %arg1[%c0_4, %c0_5, %c96] : memref<2x136x128xf32, #tpu.memory_space<vmem>>, vector<1x32x32xf32>
    %4 = vector.shape_cast %3 : vector<1x32x32xf32> to vector<32x32xf32>
    %c0_6 = arith.constant 0 : index
    %c32 = arith.constant 32 : index
    %c0_7 = arith.constant 0 : index
    %5 = vector.load %arg1[%c0_6, %c32, %c0_7] : memref<2x136x128xf32, #tpu.memory_space<vmem>>, vector<1x32x64xf32>
    %6 = vector.shape_cast %5 : vector<1x32x64xf32> to vector<32x64xf32>
    %c0_8 = arith.constant 0 : index
    %c64 = arith.constant 64 : index
    %c0_9 = arith.constant 0 : index
    %7 = vector.load %arg1[%c0_8, %c64, %c0_9] : memref<2x136x128xf32, #tpu.memory_space<vmem>>, vector<1x64x32xf32>
    %8 = vector.shape_cast %7 : vector<1x64x32xf32> to vector<64x32xf32>
    %c0_10 = arith.constant 0 : index
    %c128 = arith.constant 128 : index
    %c0_11 = arith.constant 0 : index
    %9 = vector.load %arg1[%c0_10, %c128, %c0_11] : memref<2x136x128xf32, #tpu.memory_space<vmem>>, vector<1x1x32xf32>
    %10 = vector.shape_cast %9 : vector<1x1x32xf32> to vector<1x32xf32>
    %c0_12 = arith.constant 0 : index
    %c129 = arith.constant 129 : index
    %c0_13 = arith.constant 0 : index
    %11 = vector.load %arg1[%c0_12, %c129, %c0_13] : memref<2x136x128xf32, #tpu.memory_space<vmem>>, vector<1x1x32xf32>
    %12 = vector.shape_cast %11 : vector<1x1x32xf32> to vector<1x32xf32>
    %c0_14 = arith.constant 0 : index
    %c130 = arith.constant 130 : index
    %c0_15 = arith.constant 0 : index
    %13 = vector.load %arg1[%c0_14, %c130, %c0_15] : memref<2x136x128xf32, #tpu.memory_space<vmem>>, vector<1x1x32xf32>
    %14 = vector.shape_cast %13 : vector<1x1x32xf32> to vector<1x32xf32>
    %c0_16 = arith.constant 0 : index
    %c131 = arith.constant 131 : index
    %c0_17 = arith.constant 0 : index
    %15 = vector.load %arg1[%c0_16, %c131, %c0_17] : memref<2x136x128xf32, #tpu.memory_space<vmem>>, vector<1x1x32xf32>
    %16 = vector.shape_cast %15 : vector<1x1x32xf32> to vector<1x32xf32>
    %c0_18 = arith.constant 0 : index
    %c132 = arith.constant 132 : index
    %c0_19 = arith.constant 0 : index
    %17 = vector.load %arg1[%c0_18, %c132, %c0_19] : memref<2x136x128xf32, #tpu.memory_space<vmem>>, vector<1x1x32xf32>
    %18 = vector.shape_cast %17 : vector<1x1x32xf32> to vector<1x32xf32>
    %c0_20 = arith.constant 0 : index
    %c133 = arith.constant 133 : index
    %c0_21 = arith.constant 0 : index
    %19 = vector.load %arg1[%c0_20, %c133, %c0_21] : memref<2x136x128xf32, #tpu.memory_space<vmem>>, vector<1x1x64xf32>
    %20 = vector.shape_cast %19 : vector<1x1x64xf32> to vector<1x64xf32>
    %c0_22 = arith.constant 0 : index
    %c134 = arith.constant 134 : index
    %c0_23 = arith.constant 0 : index
    %21 = vector.load %arg1[%c0_22, %c134, %c0_23] : memref<2x136x128xf32, #tpu.memory_space<vmem>>, vector<1x1x32xf32>
    %22 = vector.shape_cast %21 : vector<1x1x32xf32> to vector<1x32xf32>
    %cst = arith.constant dense<0.000000e+00> : vector<16xf32>
    %23 = vector.multi_reduction <add>, %0, %cst [1] : vector<16x32xf32> to vector<16xf32>
    %24 = vector.shape_cast %23 : vector<16xf32> to vector<16x1xf32>
    %cst_24 = arith.constant 3.200000e+01 : f32
    %25 = vector.broadcast %cst_24 : f32 to vector<16x1xf32>
    %26 = arith.divf %24, %25 : vector<16x1xf32>
    %27 = vector.broadcast %26 : vector<16x1xf32> to vector<16x32xf32>
    %28 = arith.subf %0, %27 : vector<16x32xf32>
    %29 = arith.mulf %28, %28 : vector<16x32xf32>
    %cst_25 = arith.constant dense<0.000000e+00> : vector<16xf32>
    %30 = vector.multi_reduction <add>, %29, %cst_25 [1] : vector<16x32xf32> to vector<16xf32>
    %31 = vector.shape_cast %30 : vector<16xf32> to vector<16x1xf32>
    %cst_26 = arith.constant 3.200000e+01 : f32
    %32 = vector.broadcast %cst_26 : f32 to vector<16x1xf32>
    %33 = arith.divf %31, %32 : vector<16x1xf32>
    %34 = vector.broadcast %26 : vector<16x1xf32> to vector<16x32xf32>
    %35 = arith.subf %0, %34 : vector<16x32xf32>
    %cst_27 = arith.constant 9.99999974E-6 : f32
    %36 = vector.broadcast %cst_27 : f32 to vector<16x1xf32>
    %37 = arith.addf %33, %36 : vector<16x1xf32>
    %38 = math.rsqrt %37 : vector<16x1xf32>
    %39 = vector.broadcast %38 : vector<16x1xf32> to vector<16x32xf32>
    %40 = arith.mulf %35, %39 : vector<16x32xf32>
    %41 = vector.broadcast %10 : vector<1x32xf32> to vector<16x32xf32>
    %42 = arith.mulf %40, %41 : vector<16x32xf32>
    %43 = vector.broadcast %12 : vector<1x32xf32> to vector<16x32xf32>
    %44 = arith.addf %42, %43 : vector<16x32xf32>
    %cst_28 = arith.constant dense<0.000000e+00> : vector<16x96xf32>
    %45 = tpu.matmul %44, %2, %cst_28 {dimension_numbers = #tpu.dot_dimension_numbers<[1], [0], [0], [1], [0, 0, 1, 1], [], []>} : vector<16x32xf32>, vector<32x96xf32>, vector<16x96xf32> -> vector<16x96xf32>
    %46 = vector.extract_strided_slice %45 {offsets = [0, 0], sizes = [16, 32], strides = [1, 1]} : vector<16x96xf32> to vector<16x32xf32>
    %47 = vector.extract_strided_slice %46 {offsets = [0, 0], sizes = [16, 8], strides = [1, 1]} : vector<16x32xf32> to vector<16x8xf32>
    %48 = vector.shape_cast %47 : vector<16x8xf32> to vector<2x8x8xf32>
    %49 = vector.extract_strided_slice %46 {offsets = [0, 8], sizes = [16, 8], strides = [1, 1]} : vector<16x32xf32> to vector<16x8xf32>
    %50 = vector.shape_cast %49 : vector<16x8xf32> to vector<2x8x8xf32>
    %51 = vector.extract_strided_slice %46 {offsets = [0, 16], sizes = [16, 8], strides = [1, 1]} : vector<16x32xf32> to vector<16x8xf32>
    %52 = vector.shape_cast %51 : vector<16x8xf32> to vector<2x8x8xf32>
    %53 = vector.extract_strided_slice %46 {offsets = [0, 24], sizes = [16, 8], strides = [1, 1]} : vector<16x32xf32> to vector<16x8xf32>
    %54 = vector.shape_cast %53 : vector<16x8xf32> to vector<2x8x8xf32>
    %55 = tpu.concatenate %48, %50, %52, %54 in 0 : vector<2x8x8xf32>, vector<2x8x8xf32>, vector<2x8x8xf32>, vector<2x8x8xf32> -> vector<8x8x8xf32>
    %56 = vector.extract_strided_slice %45 {offsets = [0, 32], sizes = [16, 32], strides = [1, 1]} : vector<16x96xf32> to vector<16x32xf32>
    %57 = vector.extract_strided_slice %56 {offsets = [0, 0], sizes = [16, 8], strides = [1, 1]} : vector<16x32xf32> to vector<16x8xf32>
    %58 = vector.shape_cast %57 : vector<16x8xf32> to vector<2x8x8xf32>
    %59 = vector.extract_strided_slice %56 {offsets = [0, 8], sizes = [16, 8], strides = [1, 1]} : vector<16x32xf32> to vector<16x8xf32>
    %60 = vector.shape_cast %59 : vector<16x8xf32> to vector<2x8x8xf32>
    %61 = vector.extract_strided_slice %56 {offsets = [0, 16], sizes = [16, 8], strides = [1, 1]} : vector<16x32xf32> to vector<16x8xf32>
    %62 = vector.shape_cast %61 : vector<16x8xf32> to vector<2x8x8xf32>
    %63 = vector.extract_strided_slice %56 {offsets = [0, 24], sizes = [16, 8], strides = [1, 1]} : vector<16x32xf32> to vector<16x8xf32>
    %64 = vector.shape_cast %63 : vector<16x8xf32> to vector<2x8x8xf32>
    %65 = tpu.concatenate %58, %60, %62, %64 in 0 : vector<2x8x8xf32>, vector<2x8x8xf32>, vector<2x8x8xf32>, vector<2x8x8xf32> -> vector<8x8x8xf32>
    %66 = vector.extract_strided_slice %45 {offsets = [0, 64], sizes = [16, 32], strides = [1, 1]} : vector<16x96xf32> to vector<16x32xf32>
    %67 = vector.extract_strided_slice %66 {offsets = [0, 0], sizes = [16, 8], strides = [1, 1]} : vector<16x32xf32> to vector<16x8xf32>
    %68 = vector.shape_cast %67 : vector<16x8xf32> to vector<2x8x8xf32>
    %69 = vector.extract_strided_slice %66 {offsets = [0, 8], sizes = [16, 8], strides = [1, 1]} : vector<16x32xf32> to vector<16x8xf32>
    %70 = vector.shape_cast %69 : vector<16x8xf32> to vector<2x8x8xf32>
    %71 = vector.extract_strided_slice %66 {offsets = [0, 16], sizes = [16, 8], strides = [1, 1]} : vector<16x32xf32> to vector<16x8xf32>
    %72 = vector.shape_cast %71 : vector<16x8xf32> to vector<2x8x8xf32>
    %73 = vector.extract_strided_slice %66 {offsets = [0, 24], sizes = [16, 8], strides = [1, 1]} : vector<16x32xf32> to vector<16x8xf32>
    %74 = vector.shape_cast %73 : vector<16x8xf32> to vector<2x8x8xf32>
    %75 = tpu.concatenate %68, %70, %72, %74 in 0 : vector<2x8x8xf32>, vector<2x8x8xf32>, vector<2x8x8xf32>, vector<2x8x8xf32> -> vector<8x8x8xf32>
    "tpu.trace_start"() <{level = 10 : i32, message = "znd,zmd->znm"}> : () -> ()
    %cst_29 = arith.constant dense<0.000000e+00> : vector<8x8x8xf32>
    %76 = tpu.matmul %55, %65, %cst_29 {dimension_numbers = #tpu.dot_dimension_numbers<[2], [2], [1], [1], [0, 0, 0, 1, 1, 1], [0], [0]>} : vector<8x8x8xf32>, vector<8x8x8xf32>, vector<8x8x8xf32> -> vector<8x8x8xf32>
    "tpu.trace_stop"() : () -> ()
    %cst_30 = arith.constant 0.353553385 : f32
    %77 = vector.broadcast %cst_30 : f32 to vector<8x8x8xf32>
    %78 = arith.mulf %76, %77 : vector<8x8x8xf32>
    %cst_31 = arith.constant dense<0xFF800000> : vector<8x8xf32>
    %79 = vector.multi_reduction <maximumf>, %78, %cst_31 [2] : vector<8x8x8xf32> to vector<8x8xf32>
    %80 = vector.shape_cast %79 : vector<8x8xf32> to vector<8x8x1xf32>
    %81 = vector.broadcast %80 : vector<8x8x1xf32> to vector<8x8x8xf32>
    %82 = arith.subf %78, %81 : vector<8x8x8xf32>
    %83 = math.exp %82 : vector<8x8x8xf32>
    %cst_32 = arith.constant dense<0.000000e+00> : vector<8x8xf32>
    %84 = vector.multi_reduction <add>, %83, %cst_32 [2] : vector<8x8x8xf32> to vector<8x8xf32>
    %85 = vector.shape_cast %84 : vector<8x8xf32> to vector<8x8x1xf32>
    %86 = tpu.reciprocal %85 {approx = true} : vector<8x8x1xf32> -> vector<8x8x1xf32>
    %87 = vector.broadcast %86 : vector<8x8x1xf32> to vector<8x8x8xf32>
    %88 = arith.mulf %83, %87 : vector<8x8x8xf32>
    "tpu.trace_start"() <{level = 10 : i32, message = "znm,zmd->znd"}> : () -> ()
    %cst_33 = arith.constant dense<0.000000e+00> : vector<8x8x8xf32>
    %89 = tpu.matmul %88, %75, %cst_33 {dimension_numbers = #tpu.dot_dimension_numbers<[2], [1], [1], [2], [0, 0, 0, 1, 1, 2], [0], [0]>} : vector<8x8x8xf32>, vector<8x8x8xf32>, vector<8x8x8xf32> -> vector<8x8x8xf32>
    "tpu.trace_stop"() : () -> ()
    %90 = vector.extract_strided_slice %89 {offsets = [0, 0, 0], sizes = [2, 8, 8], strides = [1, 1, 1]} : vector<8x8x8xf32> to vector<2x8x8xf32>
    %91 = vector.shape_cast %90 : vector<2x8x8xf32> to vector<16x8xf32>
    %92 = vector.extract_strided_slice %89 {offsets = [2, 0, 0], sizes = [2, 8, 8], strides = [1, 1, 1]} : vector<8x8x8xf32> to vector<2x8x8xf32>
    %93 = vector.shape_cast %92 : vector<2x8x8xf32> to vector<16x8xf32>
    %94 = vector.extract_strided_slice %89 {offsets = [4, 0, 0], sizes = [2, 8, 8], strides = [1, 1, 1]} : vector<8x8x8xf32> to vector<2x8x8xf32>
    %95 = vector.shape_cast %94 : vector<2x8x8xf32> to vector<16x8xf32>
    %96 = vector.extract_strided_slice %89 {offsets = [6, 0, 0], sizes = [2, 8, 8], strides = [1, 1, 1]} : vector<8x8x8xf32> to vector<2x8x8xf32>
    %97 = vector.shape_cast %96 : vector<2x8x8xf32> to vector<16x8xf32>
    %98 = tpu.concatenate %91, %93, %95, %97 in 1 : vector<16x8xf32>, vector<16x8xf32>, vector<16x8xf32>, vector<16x8xf32> -> vector<16x32xf32>
    %cst_34 = arith.constant dense<0.000000e+00> : vector<16x32xf32>
    %99 = tpu.matmul %98, %4, %cst_34 {dimension_numbers = #tpu.dot_dimension_numbers<[1], [0], [0], [1], [0, 0, 1, 1], [], []>} : vector<16x32xf32>, vector<32x32xf32>, vector<16x32xf32> -> vector<16x32xf32>
    %100 = vector.broadcast %14 : vector<1x32xf32> to vector<16x32xf32>
    %101 = arith.addf %99, %100 : vector<16x32xf32>
    %102 = arith.addf %0, %101 : vector<16x32xf32>
    %cst_35 = arith.constant dense<0.000000e+00> : vector<16xf32>
    %103 = vector.multi_reduction <add>, %102, %cst_35 [1] : vector<16x32xf32> to vector<16xf32>
    %104 = vector.shape_cast %103 : vector<16xf32> to vector<16x1xf32>
    %cst_36 = arith.constant 3.200000e+01 : f32
    %105 = vector.broadcast %cst_36 : f32 to vector<16x1xf32>
    %106 = arith.divf %104, %105 : vector<16x1xf32>
    %107 = vector.broadcast %106 : vector<16x1xf32> to vector<16x32xf32>
    %108 = arith.subf %102, %107 : vector<16x32xf32>
    %109 = arith.mulf %108, %108 : vector<16x32xf32>
    %cst_37 = arith.constant dense<0.000000e+00> : vector<16xf32>
    %110 = vector.multi_reduction <add>, %109, %cst_37 [1] : vector<16x32xf32> to vector<16xf32>
    %111 = vector.shape_cast %110 : vector<16xf32> to vector<16x1xf32>
    %cst_38 = arith.constant 3.200000e+01 : f32
    %112 = vector.broadcast %cst_38 : f32 to vector<16x1xf32>
    %113 = arith.divf %111, %112 : vector<16x1xf32>
    %114 = vector.broadcast %106 : vector<16x1xf32> to vector<16x32xf32>
    %115 = arith.subf %102, %114 : vector<16x32xf32>
    %cst_39 = arith.constant 9.99999974E-6 : f32
    %116 = vector.broadcast %cst_39 : f32 to vector<16x1xf32>
    %117 = arith.addf %113, %116 : vector<16x1xf32>
    %118 = math.rsqrt %117 : vector<16x1xf32>
    %119 = vector.broadcast %118 : vector<16x1xf32> to vector<16x32xf32>
    %120 = arith.mulf %115, %119 : vector<16x32xf32>
    %121 = vector.broadcast %16 : vector<1x32xf32> to vector<16x32xf32>
    %122 = arith.mulf %120, %121 : vector<16x32xf32>
    %123 = vector.broadcast %18 : vector<1x32xf32> to vector<16x32xf32>
    %124 = arith.addf %122, %123 : vector<16x32xf32>
    %cst_40 = arith.constant dense<0.000000e+00> : vector<16x64xf32>
    %125 = tpu.matmul %124, %6, %cst_40 {dimension_numbers = #tpu.dot_dimension_numbers<[1], [0], [0], [1], [0, 0, 1, 1], [], []>} : vector<16x32xf32>, vector<32x64xf32>, vector<16x64xf32> -> vector<16x64xf32>
    %126 = vector.broadcast %20 : vector<1x64xf32> to vector<16x64xf32>
    %127 = arith.addf %125, %126 : vector<16x64xf32>
    %cst_41 = arith.constant 5.000000e-01 : f32
    %128 = vector.broadcast %cst_41 : f32 to vector<16x64xf32>
    %129 = arith.mulf %128, %127 : vector<16x64xf32>
    %cst_42 = arith.constant 0.707106769 : f32
    %130 = vector.broadcast %cst_42 : f32 to vector<16x64xf32>
    %131 = arith.mulf %127, %130 : vector<16x64xf32>
    %132 = math.absf %131 : vector<16x64xf32>
    %cst_43 = arith.constant 0.327591091 : f32
    %133 = vector.broadcast %cst_43 : f32 to vector<16x64xf32>
    %134 = arith.mulf %133, %132 : vector<16x64xf32>
    %cst_44 = arith.constant 1.000000e+00 : f32
    %135 = vector.broadcast %cst_44 : f32 to vector<16x64xf32>
    %136 = arith.addf %135, %134 : vector<16x64xf32>
    %cst_45 = arith.constant 1.000000e+00 : f32
    %137 = vector.broadcast %cst_45 : f32 to vector<16x64xf32>
    %138 = arith.divf %137, %136 : vector<16x64xf32>
    %cst_46 = arith.constant 1.06140542 : f32
    %139 = vector.broadcast %cst_46 : f32 to vector<16x64xf32>
    %140 = arith.mulf %139, %138 : vector<16x64xf32>
    %cst_47 = arith.constant 1.45315206 : f32
    %141 = vector.broadcast %cst_47 : f32 to vector<16x64xf32>
    %142 = arith.subf %140, %141 : vector<16x64xf32>
    %143 = arith.mulf %142, %138 : vector<16x64xf32>
    %cst_48 = arith.constant 1.42141378 : f32
    %144 = vector.broadcast %cst_48 : f32 to vector<16x64xf32>
    %145 = arith.addf %143, %144 : vector<16x64xf32>
    %146 = arith.mulf %145, %138 : vector<16x64xf32>
    %cst_49 = arith.constant 0.284496725 : f32
    %147 = vector.broadcast %cst_49 : f32 to vector<16x64xf32>
    %148 = arith.subf %146, %147 : vector<16x64xf32>
    %149 = arith.mulf %148, %138 : vector<16x64xf32>
    %cst_50 = arith.constant 0.254829586 : f32
    %150 = vector.broadcast %cst_50 : f32 to vector<16x64xf32>
    %151 = arith.addf %149, %150 : vector<16x64xf32>
    %152 = arith.mulf %151, %138 : vector<16x64xf32>
    %cst_51 = arith.constant 0.000000e+00 : f32
    %153 = vector.broadcast %cst_51 : f32 to vector<16x64xf32>
    %154 = arith.subf %153, %132 : vector<16x64xf32>
    %155 = arith.mulf %154, %132 : vector<16x64xf32>
    %156 = math.exp %155 : vector<16x64xf32>
    %157 = arith.mulf %152, %156 : vector<16x64xf32>
    %cst_52 = arith.constant 1.000000e+00 : f32
    %158 = vector.broadcast %cst_52 : f32 to vector<16x64xf32>
    %159 = arith.subf %158, %157 : vector<16x64xf32>
    %cst_53 = arith.constant 0.000000e+00 : f32
    %160 = vector.broadcast %cst_53 : f32 to vector<16x64xf32>
    %161 = arith.cmpf olt, %131, %160 : vector<16x64xf32>
    %cst_54 = arith.constant 0.000000e+00 : f32
    %162 = vector.broadcast %cst_54 : f32 to vector<16x64xf32>
    %163 = arith.subf %162, %159 : vector<16x64xf32>
    %164 = arith.select %161, %163, %159 : vector<16x64xi1>, vector<16x64xf32>
    %cst_55 = arith.constant 1.000000e+00 : f32
    %165 = vector.broadcast %cst_55 : f32 to vector<16x64xf32>
    %166 = arith.addf %165, %164 : vector<16x64xf32>
    %167 = arith.mulf %129, %166 : vector<16x64xf32>
    %cst_56 = arith.constant dense<0.000000e+00> : vector<16x32xf32>
    %168 = tpu.matmul %167, %8, %cst_56 {dimension_numbers = #tpu.dot_dimension_numbers<[1], [0], [0], [1], [0, 0, 1, 1], [], []>} : vector<16x64xf32>, vector<64x32xf32>, vector<16x32xf32> -> vector<16x32xf32>
    %169 = vector.broadcast %22 : vector<1x32xf32> to vector<16x32xf32>
    %170 = arith.addf %168, %169 : vector<16x32xf32>
    %171 = arith.addf %102, %170 : vector<16x32xf32>
    %c1 = arith.constant 1 : index
    %c0_57 = arith.constant 0 : index
    %c0_58 = arith.constant 0 : index
    %172 = vector.load %arg1[%c1, %c0_57, %c0_58] : memref<2x136x128xf32, #tpu.memory_space<vmem>>, vector<1x32x96xf32>
    %173 = vector.shape_cast %172 : vector<1x32x96xf32> to vector<32x96xf32>
    %c1_59 = arith.constant 1 : index
    %c0_60 = arith.constant 0 : index
    %c96_61 = arith.constant 96 : index
    %174 = vector.load %arg1[%c1_59, %c0_60, %c96_61] : memref<2x136x128xf32, #tpu.memory_space<vmem>>, vector<1x32x32xf32>
    %175 = vector.shape_cast %174 : vector<1x32x32xf32> to vector<32x32xf32>
    %c1_62 = arith.constant 1 : index
    %c32_63 = arith.constant 32 : index
    %c0_64 = arith.constant 0 : index
    %176 = vector.load %arg1[%c1_62, %c32_63, %c0_64] : memref<2x136x128xf32, #tpu.memory_space<vmem>>, vector<1x32x64xf32>
    %177 = vector.shape_cast %176 : vector<1x32x64xf32> to vector<32x64xf32>
    %c1_65 = arith.constant 1 : index
    %c64_66 = arith.constant 64 : index
    %c0_67 = arith.constant 0 : index
    %178 = vector.load %arg1[%c1_65, %c64_66, %c0_67] : memref<2x136x128xf32, #tpu.memory_space<vmem>>, vector<1x64x32xf32>
    %179 = vector.shape_cast %178 : vector<1x64x32xf32> to vector<64x32xf32>
    %c1_68 = arith.constant 1 : index
    %c128_69 = arith.constant 128 : index
    %c0_70 = arith.constant 0 : index
    %180 = vector.load %arg1[%c1_68, %c128_69, %c0_70] : memref<2x136x128xf32, #tpu.memory_space<vmem>>, vector<1x1x32xf32>
    %181 = vector.shape_cast %180 : vector<1x1x32xf32> to vector<1x32xf32>
    %c1_71 = arith.constant 1 : index
    %c129_72 = arith.constant 129 : index
    %c0_73 = arith.constant 0 : index
    %182 = vector.load %arg1[%c1_71, %c129_72, %c0_73] : memref<2x136x128xf32, #tpu.memory_space<vmem>>, vector<1x1x32xf32>
    %183 = vector.shape_cast %182 : vector<1x1x32xf32> to vector<1x32xf32>
    %c1_74 = arith.constant 1 : index
    %c130_75 = arith.constant 130 : index
    %c0_76 = arith.constant 0 : index
    %184 = vector.load %arg1[%c1_74, %c130_75, %c0_76] : memref<2x136x128xf32, #tpu.memory_space<vmem>>, vector<1x1x32xf32>
    %185 = vector.shape_cast %184 : vector<1x1x32xf32> to vector<1x32xf32>
    %c1_77 = arith.constant 1 : index
    %c131_78 = arith.constant 131 : index
    %c0_79 = arith.constant 0 : index
    %186 = vector.load %arg1[%c1_77, %c131_78, %c0_79] : memref<2x136x128xf32, #tpu.memory_space<vmem>>, vector<1x1x32xf32>
    %187 = vector.shape_cast %186 : vector<1x1x32xf32> to vector<1x32xf32>
    %c1_80 = arith.constant 1 : index
    %c132_81 = arith.constant 132 : index
    %c0_82 = arith.constant 0 : index
    %188 = vector.load %arg1[%c1_80, %c132_81, %c0_82] : memref<2x136x128xf32, #tpu.memory_space<vmem>>, vector<1x1x32xf32>
    %189 = vector.shape_cast %188 : vector<1x1x32xf32> to vector<1x32xf32>
    %c1_83 = arith.constant 1 : index
    %c133_84 = arith.constant 133 : index
    %c0_85 = arith.constant 0 : index
    %190 = vector.load %arg1[%c1_83, %c133_84, %c0_85] : memref<2x136x128xf32, #tpu.memory_space<vmem>>, vector<1x1x64xf32>
    %191 = vector.shape_cast %190 : vector<1x1x64xf32> to vector<1x64xf32>
    %c1_86 = arith.constant 1 : index
    %c134_87 = arith.constant 134 : index
    %c0_88 = arith.constant 0 : index
    %192 = vector.load %arg1[%c1_86, %c134_87, %c0_88] : memref<2x136x128xf32, #tpu.memory_space<vmem>>, vector<1x1x32xf32>
    %193 = vector.shape_cast %192 : vector<1x1x32xf32> to vector<1x32xf32>
    %cst_89 = arith.constant dense<0.000000e+00> : vector<16xf32>
    %194 = vector.multi_reduction <add>, %171, %cst_89 [1] : vector<16x32xf32> to vector<16xf32>
    %195 = vector.shape_cast %194 : vector<16xf32> to vector<16x1xf32>
    %cst_90 = arith.constant 3.200000e+01 : f32
    %196 = vector.broadcast %cst_90 : f32 to vector<16x1xf32>
    %197 = arith.divf %195, %196 : vector<16x1xf32>
    %198 = vector.broadcast %197 : vector<16x1xf32> to vector<16x32xf32>
    %199 = arith.subf %171, %198 : vector<16x32xf32>
    %200 = arith.mulf %199, %199 : vector<16x32xf32>
    %cst_91 = arith.constant dense<0.000000e+00> : vector<16xf32>
    %201 = vector.multi_reduction <add>, %200, %cst_91 [1] : vector<16x32xf32> to vector<16xf32>
    %202 = vector.shape_cast %201 : vector<16xf32> to vector<16x1xf32>
    %cst_92 = arith.constant 3.200000e+01 : f32
    %203 = vector.broadcast %cst_92 : f32 to vector<16x1xf32>
    %204 = arith.divf %202, %203 : vector<16x1xf32>
    %205 = vector.broadcast %197 : vector<16x1xf32> to vector<16x32xf32>
    %206 = arith.subf %171, %205 : vector<16x32xf32>
    %cst_93 = arith.constant 9.99999974E-6 : f32
    %207 = vector.broadcast %cst_93 : f32 to vector<16x1xf32>
    %208 = arith.addf %204, %207 : vector<16x1xf32>
    %209 = math.rsqrt %208 : vector<16x1xf32>
    %210 = vector.broadcast %209 : vector<16x1xf32> to vector<16x32xf32>
    %211 = arith.mulf %206, %210 : vector<16x32xf32>
    %212 = vector.broadcast %181 : vector<1x32xf32> to vector<16x32xf32>
    %213 = arith.mulf %211, %212 : vector<16x32xf32>
    %214 = vector.broadcast %183 : vector<1x32xf32> to vector<16x32xf32>
    %215 = arith.addf %213, %214 : vector<16x32xf32>
    %cst_94 = arith.constant dense<0.000000e+00> : vector<16x96xf32>
    %216 = tpu.matmul %215, %173, %cst_94 {dimension_numbers = #tpu.dot_dimension_numbers<[1], [0], [0], [1], [0, 0, 1, 1], [], []>} : vector<16x32xf32>, vector<32x96xf32>, vector<16x96xf32> -> vector<16x96xf32>
    %217 = vector.extract_strided_slice %216 {offsets = [0, 0], sizes = [16, 32], strides = [1, 1]} : vector<16x96xf32> to vector<16x32xf32>
    %218 = vector.extract_strided_slice %217 {offsets = [0, 0], sizes = [16, 8], strides = [1, 1]} : vector<16x32xf32> to vector<16x8xf32>
    %219 = vector.shape_cast %218 : vector<16x8xf32> to vector<2x8x8xf32>
    %220 = vector.extract_strided_slice %217 {offsets = [0, 8], sizes = [16, 8], strides = [1, 1]} : vector<16x32xf32> to vector<16x8xf32>
    %221 = vector.shape_cast %220 : vector<16x8xf32> to vector<2x8x8xf32>
    %222 = vector.extract_strided_slice %217 {offsets = [0, 16], sizes = [16, 8], strides = [1, 1]} : vector<16x32xf32> to vector<16x8xf32>
    %223 = vector.shape_cast %222 : vector<16x8xf32> to vector<2x8x8xf32>
    %224 = vector.extract_strided_slice %217 {offsets = [0, 24], sizes = [16, 8], strides = [1, 1]} : vector<16x32xf32> to vector<16x8xf32>
    %225 = vector.shape_cast %224 : vector<16x8xf32> to vector<2x8x8xf32>
    %226 = tpu.concatenate %219, %221, %223, %225 in 0 : vector<2x8x8xf32>, vector<2x8x8xf32>, vector<2x8x8xf32>, vector<2x8x8xf32> -> vector<8x8x8xf32>
    %227 = vector.extract_strided_slice %216 {offsets = [0, 32], sizes = [16, 32], strides = [1, 1]} : vector<16x96xf32> to vector<16x32xf32>
    %228 = vector.extract_strided_slice %227 {offsets = [0, 0], sizes = [16, 8], strides = [1, 1]} : vector<16x32xf32> to vector<16x8xf32>
    %229 = vector.shape_cast %228 : vector<16x8xf32> to vector<2x8x8xf32>
    %230 = vector.extract_strided_slice %227 {offsets = [0, 8], sizes = [16, 8], strides = [1, 1]} : vector<16x32xf32> to vector<16x8xf32>
    %231 = vector.shape_cast %230 : vector<16x8xf32> to vector<2x8x8xf32>
    %232 = vector.extract_strided_slice %227 {offsets = [0, 16], sizes = [16, 8], strides = [1, 1]} : vector<16x32xf32> to vector<16x8xf32>
    %233 = vector.shape_cast %232 : vector<16x8xf32> to vector<2x8x8xf32>
    %234 = vector.extract_strided_slice %227 {offsets = [0, 24], sizes = [16, 8], strides = [1, 1]} : vector<16x32xf32> to vector<16x8xf32>
    %235 = vector.shape_cast %234 : vector<16x8xf32> to vector<2x8x8xf32>
    %236 = tpu.concatenate %229, %231, %233, %235 in 0 : vector<2x8x8xf32>, vector<2x8x8xf32>, vector<2x8x8xf32>, vector<2x8x8xf32> -> vector<8x8x8xf32>
    %237 = vector.extract_strided_slice %216 {offsets = [0, 64], sizes = [16, 32], strides = [1, 1]} : vector<16x96xf32> to vector<16x32xf32>
    %238 = vector.extract_strided_slice %237 {offsets = [0, 0], sizes = [16, 8], strides = [1, 1]} : vector<16x32xf32> to vector<16x8xf32>
    %239 = vector.shape_cast %238 : vector<16x8xf32> to vector<2x8x8xf32>
    %240 = vector.extract_strided_slice %237 {offsets = [0, 8], sizes = [16, 8], strides = [1, 1]} : vector<16x32xf32> to vector<16x8xf32>
    %241 = vector.shape_cast %240 : vector<16x8xf32> to vector<2x8x8xf32>
    %242 = vector.extract_strided_slice %237 {offsets = [0, 16], sizes = [16, 8], strides = [1, 1]} : vector<16x32xf32> to vector<16x8xf32>
    %243 = vector.shape_cast %242 : vector<16x8xf32> to vector<2x8x8xf32>
    %244 = vector.extract_strided_slice %237 {offsets = [0, 24], sizes = [16, 8], strides = [1, 1]} : vector<16x32xf32> to vector<16x8xf32>
    %245 = vector.shape_cast %244 : vector<16x8xf32> to vector<2x8x8xf32>
    %246 = tpu.concatenate %239, %241, %243, %245 in 0 : vector<2x8x8xf32>, vector<2x8x8xf32>, vector<2x8x8xf32>, vector<2x8x8xf32> -> vector<8x8x8xf32>
    "tpu.trace_start"() <{level = 10 : i32, message = "znd,zmd->znm"}> : () -> ()
    %cst_95 = arith.constant dense<0.000000e+00> : vector<8x8x8xf32>
    %247 = tpu.matmul %226, %236, %cst_95 {dimension_numbers = #tpu.dot_dimension_numbers<[2], [2], [1], [1], [0, 0, 0, 1, 1, 1], [0], [0]>} : vector<8x8x8xf32>, vector<8x8x8xf32>, vector<8x8x8xf32> -> vector<8x8x8xf32>
    "tpu.trace_stop"() : () -> ()
    %cst_96 = arith.constant 0.353553385 : f32
    %248 = vector.broadcast %cst_96 : f32 to vector<8x8x8xf32>
    %249 = arith.mulf %247, %248 : vector<8x8x8xf32>
    %cst_97 = arith.constant dense<0xFF800000> : vector<8x8xf32>
    %250 = vector.multi_reduction <maximumf>, %249, %cst_97 [2] : vector<8x8x8xf32> to vector<8x8xf32>
    %251 = vector.shape_cast %250 : vector<8x8xf32> to vector<8x8x1xf32>
    %252 = vector.broadcast %251 : vector<8x8x1xf32> to vector<8x8x8xf32>
    %253 = arith.subf %249, %252 : vector<8x8x8xf32>
    %254 = math.exp %253 : vector<8x8x8xf32>
    %cst_98 = arith.constant dense<0.000000e+00> : vector<8x8xf32>
    %255 = vector.multi_reduction <add>, %254, %cst_98 [2] : vector<8x8x8xf32> to vector<8x8xf32>
    %256 = vector.shape_cast %255 : vector<8x8xf32> to vector<8x8x1xf32>
    %257 = tpu.reciprocal %256 {approx = true} : vector<8x8x1xf32> -> vector<8x8x1xf32>
    %258 = vector.broadcast %257 : vector<8x8x1xf32> to vector<8x8x8xf32>
    %259 = arith.mulf %254, %258 : vector<8x8x8xf32>
    "tpu.trace_start"() <{level = 10 : i32, message = "znm,zmd->znd"}> : () -> ()
    %cst_99 = arith.constant dense<0.000000e+00> : vector<8x8x8xf32>
    %260 = tpu.matmul %259, %246, %cst_99 {dimension_numbers = #tpu.dot_dimension_numbers<[2], [1], [1], [2], [0, 0, 0, 1, 1, 2], [0], [0]>} : vector<8x8x8xf32>, vector<8x8x8xf32>, vector<8x8x8xf32> -> vector<8x8x8xf32>
    "tpu.trace_stop"() : () -> ()
    %261 = vector.extract_strided_slice %260 {offsets = [0, 0, 0], sizes = [2, 8, 8], strides = [1, 1, 1]} : vector<8x8x8xf32> to vector<2x8x8xf32>
    %262 = vector.shape_cast %261 : vector<2x8x8xf32> to vector<16x8xf32>
    %263 = vector.extract_strided_slice %260 {offsets = [2, 0, 0], sizes = [2, 8, 8], strides = [1, 1, 1]} : vector<8x8x8xf32> to vector<2x8x8xf32>
    %264 = vector.shape_cast %263 : vector<2x8x8xf32> to vector<16x8xf32>
    %265 = vector.extract_strided_slice %260 {offsets = [4, 0, 0], sizes = [2, 8, 8], strides = [1, 1, 1]} : vector<8x8x8xf32> to vector<2x8x8xf32>
    %266 = vector.shape_cast %265 : vector<2x8x8xf32> to vector<16x8xf32>
    %267 = vector.extract_strided_slice %260 {offsets = [6, 0, 0], sizes = [2, 8, 8], strides = [1, 1, 1]} : vector<8x8x8xf32> to vector<2x8x8xf32>
    %268 = vector.shape_cast %267 : vector<2x8x8xf32> to vector<16x8xf32>
    %269 = tpu.concatenate %262, %264, %266, %268 in 1 : vector<16x8xf32>, vector<16x8xf32>, vector<16x8xf32>, vector<16x8xf32> -> vector<16x32xf32>
    %cst_100 = arith.constant dense<0.000000e+00> : vector<16x32xf32>
    %270 = tpu.matmul %269, %175, %cst_100 {dimension_numbers = #tpu.dot_dimension_numbers<[1], [0], [0], [1], [0, 0, 1, 1], [], []>} : vector<16x32xf32>, vector<32x32xf32>, vector<16x32xf32> -> vector<16x32xf32>
    %271 = vector.broadcast %185 : vector<1x32xf32> to vector<16x32xf32>
    %272 = arith.addf %270, %271 : vector<16x32xf32>
    %273 = arith.addf %171, %272 : vector<16x32xf32>
    %cst_101 = arith.constant dense<0.000000e+00> : vector<16xf32>
    %274 = vector.multi_reduction <add>, %273, %cst_101 [1] : vector<16x32xf32> to vector<16xf32>
    %275 = vector.shape_cast %274 : vector<16xf32> to vector<16x1xf32>
    %cst_102 = arith.constant 3.200000e+01 : f32
    %276 = vector.broadcast %cst_102 : f32 to vector<16x1xf32>
    %277 = arith.divf %275, %276 : vector<16x1xf32>
    %278 = vector.broadcast %277 : vector<16x1xf32> to vector<16x32xf32>
    %279 = arith.subf %273, %278 : vector<16x32xf32>
    %280 = arith.mulf %279, %279 : vector<16x32xf32>
    %cst_103 = arith.constant dense<0.000000e+00> : vector<16xf32>
    %281 = vector.multi_reduction <add>, %280, %cst_103 [1] : vector<16x32xf32> to vector<16xf32>
    %282 = vector.shape_cast %281 : vector<16xf32> to vector<16x1xf32>
    %cst_104 = arith.constant 3.200000e+01 : f32
    %283 = vector.broadcast %cst_104 : f32 to vector<16x1xf32>
    %284 = arith.divf %282, %283 : vector<16x1xf32>
    %285 = vector.broadcast %277 : vector<16x1xf32> to vector<16x32xf32>
    %286 = arith.subf %273, %285 : vector<16x32xf32>
    %cst_105 = arith.constant 9.99999974E-6 : f32
    %287 = vector.broadcast %cst_105 : f32 to vector<16x1xf32>
    %288 = arith.addf %284, %287 : vector<16x1xf32>
    %289 = math.rsqrt %288 : vector<16x1xf32>
    %290 = vector.broadcast %289 : vector<16x1xf32> to vector<16x32xf32>
    %291 = arith.mulf %286, %290 : vector<16x32xf32>
    %292 = vector.broadcast %187 : vector<1x32xf32> to vector<16x32xf32>
    %293 = arith.mulf %291, %292 : vector<16x32xf32>
    %294 = vector.broadcast %189 : vector<1x32xf32> to vector<16x32xf32>
    %295 = arith.addf %293, %294 : vector<16x32xf32>
    %cst_106 = arith.constant dense<0.000000e+00> : vector<16x64xf32>
    %296 = tpu.matmul %295, %177, %cst_106 {dimension_numbers = #tpu.dot_dimension_numbers<[1], [0], [0], [1], [0, 0, 1, 1], [], []>} : vector<16x32xf32>, vector<32x64xf32>, vector<16x64xf32> -> vector<16x64xf32>
    %297 = vector.broadcast %191 : vector<1x64xf32> to vector<16x64xf32>
    %298 = arith.addf %296, %297 : vector<16x64xf32>
    %cst_107 = arith.constant 5.000000e-01 : f32
    %299 = vector.broadcast %cst_107 : f32 to vector<16x64xf32>
    %300 = arith.mulf %299, %298 : vector<16x64xf32>
    %cst_108 = arith.constant 0.707106769 : f32
    %301 = vector.broadcast %cst_108 : f32 to vector<16x64xf32>
    %302 = arith.mulf %298, %301 : vector<16x64xf32>
    %303 = math.absf %302 : vector<16x64xf32>
    %cst_109 = arith.constant 0.327591091 : f32
    %304 = vector.broadcast %cst_109 : f32 to vector<16x64xf32>
    %305 = arith.mulf %304, %303 : vector<16x64xf32>
    %cst_110 = arith.constant 1.000000e+00 : f32
    %306 = vector.broadcast %cst_110 : f32 to vector<16x64xf32>
    %307 = arith.addf %306, %305 : vector<16x64xf32>
    %cst_111 = arith.constant 1.000000e+00 : f32
    %308 = vector.broadcast %cst_111 : f32 to vector<16x64xf32>
    %309 = arith.divf %308, %307 : vector<16x64xf32>
    %cst_112 = arith.constant 1.06140542 : f32
    %310 = vector.broadcast %cst_112 : f32 to vector<16x64xf32>
    %311 = arith.mulf %310, %309 : vector<16x64xf32>
    %cst_113 = arith.constant 1.45315206 : f32
    %312 = vector.broadcast %cst_113 : f32 to vector<16x64xf32>
    %313 = arith.subf %311, %312 : vector<16x64xf32>
    %314 = arith.mulf %313, %309 : vector<16x64xf32>
    %cst_114 = arith.constant 1.42141378 : f32
    %315 = vector.broadcast %cst_114 : f32 to vector<16x64xf32>
    %316 = arith.addf %314, %315 : vector<16x64xf32>
    %317 = arith.mulf %316, %309 : vector<16x64xf32>
    %cst_115 = arith.constant 0.284496725 : f32
    %318 = vector.broadcast %cst_115 : f32 to vector<16x64xf32>
    %319 = arith.subf %317, %318 : vector<16x64xf32>
    %320 = arith.mulf %319, %309 : vector<16x64xf32>
    %cst_116 = arith.constant 0.254829586 : f32
    %321 = vector.broadcast %cst_116 : f32 to vector<16x64xf32>
    %322 = arith.addf %320, %321 : vector<16x64xf32>
    %323 = arith.mulf %322, %309 : vector<16x64xf32>
    %cst_117 = arith.constant 0.000000e+00 : f32
    %324 = vector.broadcast %cst_117 : f32 to vector<16x64xf32>
    %325 = arith.subf %324, %303 : vector<16x64xf32>
    %326 = arith.mulf %325, %303 : vector<16x64xf32>
    %327 = math.exp %326 : vector<16x64xf32>
    %328 = arith.mulf %323, %327 : vector<16x64xf32>
    %cst_118 = arith.constant 1.000000e+00 : f32
    %329 = vector.broadcast %cst_118 : f32 to vector<16x64xf32>
    %330 = arith.subf %329, %328 : vector<16x64xf32>
    %cst_119 = arith.constant 0.000000e+00 : f32
    %331 = vector.broadcast %cst_119 : f32 to vector<16x64xf32>
    %332 = arith.cmpf olt, %302, %331 : vector<16x64xf32>
    %cst_120 = arith.constant 0.000000e+00 : f32
    %333 = vector.broadcast %cst_120 : f32 to vector<16x64xf32>
    %334 = arith.subf %333, %330 : vector<16x64xf32>
    %335 = arith.select %332, %334, %330 : vector<16x64xi1>, vector<16x64xf32>
    %cst_121 = arith.constant 1.000000e+00 : f32
    %336 = vector.broadcast %cst_121 : f32 to vector<16x64xf32>
    %337 = arith.addf %336, %335 : vector<16x64xf32>
    %338 = arith.mulf %300, %337 : vector<16x64xf32>
    %cst_122 = arith.constant dense<0.000000e+00> : vector<16x32xf32>
    %339 = tpu.matmul %338, %179, %cst_122 {dimension_numbers = #tpu.dot_dimension_numbers<[1], [0], [0], [1], [0, 0, 1, 1], [], []>} : vector<16x64xf32>, vector<64x32xf32>, vector<16x32xf32> -> vector<16x32xf32>
    %340 = vector.broadcast %193 : vector<1x32xf32> to vector<16x32xf32>
    %341 = arith.addf %339, %340 : vector<16x32xf32>
    %342 = arith.addf %273, %341 : vector<16x32xf32>
    %c0_123 = arith.constant 0 : index
    %c0_124 = arith.constant 0 : index
    %343 = vector.load %arg2[%c0_123, %c0_124] : memref<16x32xf32, #tpu.memory_space<vmem>>, vector<16x32xf32>
    tpu.vector_store %arg2[%c0_123, %c0_124], %342 {strides = array<i32>} : memref<16x32xf32, #tpu.memory_space<vmem>>, vector<16x32xf32>,
    return
  }
}

</mosaic_0001>

<bundles_post_ra>
// kernel: tpu_custom_call.1
= control target key start
LH: loop header
LB: loop body
LE: loop exit
PB: predicated region body
PF: predicated region fallthrough
CT: control target
= control target key end

     0   :  { %7 = vsyncpa [#allocation3], 0  ;;  %s2684_s0 = inlined_call_operand.hbm [shape: f32[16,32], index: 0, kind: input, shape index: {}]   ;;  %s2685_s1 = inlined_call_operand.hbm [shape: f32[2,136,128], index: 1, kind: input, shape index: {}]   ;;  %s2686_s2 = inlined_call_operand.hbm [shape: f32[16,32], index: 2, kind: output, shape index: {}]  }
   0x1   :  { %8 = vsyncpa [#allocation6], 0 }
   0x2   :  { %9 = vsyncpa [#allocation4], 0  ;;  %s14_s11 = sshll.u32 %s2684_s0, 4  ;;  %s2203_s12 = smov [#allocation2]   ;;  %s15_s11 = int_to_ptr.hbm [resolvable:$true] %s14_s11 }
   0x3   :  { %s16_s13 = sshll.u32 %s2203_s12, 4  ;;  %s27_s16 = sshll.u32 %s2685_s1, 4  ;;  %s17_s13 = int_to_ptr.vmem [resolvable:$true] %s16_s13  ;;  %s28_s16 = int_to_ptr.hbm [resolvable:$true] %s27_s16 }
   0x4   :  { %s2204_s17 = smov 128   ;;  %s2205_s18 = smov 8  }
   0x5   :  { %22 = dma.hbm_to_vmem [thread:$0]  %s15_s11, 256, %s17_s13, [#allocation3], %s2204_s17, %s2204_s17, %s2205_s18  }
   0x6   :  { %s2206_s19 = smov [#allocation5]  }
   0x7   :  { %s29_s20 = sshll.u32 %s2206_s19, 4  ;;  %s30_s20 = int_to_ptr.vmem [resolvable:$true] %s29_s20 }
   0x8   :  { %35 = dma.hbm_to_vmem [thread:$0]  %s28_s16, 4352, %s30_s20, [#allocation6], %s2204_s17, %s2204_s17, %s2205_s18  }
   0x9   :  { %2197 = dma.done.wait [#allocation3], 256  }
   0xa   :  { %2198 = vsyncadd [#allocation3], 4294967040 }
   0xb   :  { %2199 = dma.done.wait [#allocation6], 4352  }
   0xc   :  { %2200 = vsyncadd [#allocation6], 4294962944  ;;  %vm69_vm0 = vcmask 261120   ;;  %v2244_v0 = vld [vmem:[#allocation2] sm:$0xff]  ;;  %v2248_v2 = vld [vmem:[#allocation2 + $0x8] sm:$0xff]  ;;  %v2207_v4 = vmov 32.0  }
   0xd   :  { %v70_v1 = vsel %vm69_vm0, %v2244_v0, 0.0  ;;  %v73_v3 = vsel %vm69_vm0, %v2248_v2, 0.0  ;;  %2027 = vrcp.f32 %v2207_v4  ;;  %v2260_v21 = vld [vmem:[#allocation5 + $0x18] sm:$0xff]  ;;  %v2263_v22 = vld [vmem:[#allocation5 + $0x10] sm:$0xff]  ;;  %v2266_v23 = vld [vmem:[#allocation5 + $0x8] sm:$0xff]  ;;  %s2208_s0 = smov 120  }
   0xe   :  { %71 = vadd.xlane.f32.xlu0 %v70_v1  ;;  %145 = vmatpush.msra.mxu0 %v2260_v21  ;;  %v2269_v24 = vld [vmem:[#allocation5] sm:$0xff]  ;;  %v1978_v25 = vpack.i.bf16 %v2263_v22, %v2260_v21  ;;  %s2209_s1 = smov 112   ;;  %s2210_s21 = smov 104   ;;  %vm172_vm8 = vcmask 64512   ;;  %vm709_vm9 = vcmask 130048   ;;  %vm712_vm10 = vcmask 195584  }
   0xf   :  { %v1983_v26 = vpack.i.bf16 %v2269_v24, %v2266_v23  ;;  %v2013_v41 = vld [vmem:[#allocation5 + $0x80] ss:$0 sm:$0xff]  ;;  %v2014_v45 = vld [vmem:[#allocation5 + $0x81] ss:$0 sm:$0xff]  ;;  %s2211_s22 = smov 96   ;;  %s2212_s23 = smov 64  }
  0x10   :  { %146 = vmatpush.msra.mxu0 %v2263_v22  ;;  %s2213_s24 = smov 32   ;;  %s2214_s25 = smov 24  }
  0x11   :  { %s2215_s26 = smov 16   ;;  %s2216_s27 = smov [#allocation7]  }
  0x12   :  { %147 = vmatpush.msra.mxu0 %v2266_v23  ;;  %s1861_s28 = sshll.u32 %s2216_s27, 4  ;;  %s1863_s3 = sshll.u32 %s2686_s2, 4  ;;  %s1862_s28 = int_to_ptr.vmem [resolvable:$true] %s1861_s28  ;;  %s1864_s3 = int_to_ptr.hbm [resolvable:$true] %s1863_s3 }
  0x13   :  { %v2028_v5 = vpop.eup %2027 }
  0x14   :  { %v77_v6 = vmul.f32 32.0, %v2028_v5  ;;  %vm81_vm1 = vweird.f32 %v2028_v5  ;;  %148 = vmatpush.msra.mxu0 %v2269_v24 }
  0x16   :  { %74 = vadd.xlane.f32.xlu0 %v73_v3  ;;  %v78_v7 = vsub.f32 1.0, %v77_v6 }
  0x18   :  { %v79_v8 = vmul.f32 %v2028_v5, %v78_v7 }
  0x1a   :  { %v80_v9 = vadd.f32 %v2028_v5, %v79_v8 }
  0x1c   :  { %v2252_v10 = vsel %vm81_vm1, %v2028_v5, %v80_v9 }
  0x81   :  { %v72_v11 = vpop.xlane.xlu0 %71 }
  0x82   :  { %v83_v12 = vmul.f32 %v2252_v10, %v72_v11 }
  0x84   :  { %v85_v13 = vsub.f32 %v2244_v0, %v83_v12 }
  0x86   :  { %v87_v14 = vmul.f32 %v85_v13, %v85_v13 }
  0x88   :  { %v89_v15 = vsel %vm69_vm0, %v87_v14, 0.0 }
  0x89   :  { %90 = vadd.xlane.f32.xlu1 %v89_v15  ;;  %v75_v16 = vpop.xlane.xlu0 %74 }
  0x8a   :  { %v84_v17 = vmul.f32 %v2252_v10, %v75_v16 }
  0x8c   :  { %v86_v18 = vsub.f32 %v2248_v2, %v84_v17 }
  0x8e   :  { %v88_v19 = vmul.f32 %v86_v18, %v86_v18 }
  0x90   :  { %v92_v20 = vsel %vm69_vm0, %v88_v19, 0.0 }
  0x91   :  { %93 = vadd.xlane.f32.xlu1 %v92_v20 }
  0xfc   :  { %v91_v27 = vpop.xlane.xlu1 %90 }
  0xfd   :  { %v95_v28 = vmul.f32 %v91_v27, %v2252_v10 }
  0xff   :  { %v97_v29 = vadd.f32 1e-05, %v95_v28 }
 0x101   :  { %2029 = vrsqrt.f32 %v97_v29  ;;  %vm105_vm3 = vweird.f32 %v97_v29 }
 0x104   :  { %v94_v30 = vpop.xlane.xlu1 %93 }
 0x105   :  { %v96_v31 = vmul.f32 %v94_v30, %v2252_v10 }
 0x107   :  { %v2030_v32 = vpop.eup %2029  ;;  %v98_v33 = vadd.f32 1e-05, %v96_v31 }
 0x108   :  { %v100_v34 = vmul.f32 %v2030_v32, %v97_v29  ;;  %vm106_vm2 = vweird.f32 %v2030_v32 }
 0x109   :  { %2031 = vrsqrt.f32 %v98_v33  ;;  %vm107_vm4 = vmor %vm105_vm3, %vm106_vm2  ;;  %vm115_vm6 = vweird.f32 %v98_v33 }
 0x10a   :  { %v101_v35 = vmul.f32 %v2030_v32, %v100_v34 }
 0x10c   :  { %v102_v36 = vmul.f32 0.5, %v101_v35 }
 0x10e   :  { %v103_v37 = vsub.f32 1.5, %v102_v36 }
 0x10f   :  { %v2032_v38 = vpop.eup %2031 }
 0x110   :  { %v104_v39 = vmul.f32 %v2030_v32, %v103_v37  ;;  %v110_v40 = vmul.f32 %v2032_v38, %v98_v33  ;;  %vm116_vm5 = vweird.f32 %v2032_v38 }
 0x111   :  { %vm117_vm7 = vmor %vm115_vm6, %vm116_vm5 }
 0x112   :  { %v108_v42 = vsel %vm107_vm4, %v2030_v32, %v104_v39  ;;  %v111_v43 = vmul.f32 %v2032_v38, %v110_v40 }
 0x113   :  { %v119_v44 = vmul.f32 %v108_v42, %v85_v13 }
 0x114   :  { %v112_v46 = vmul.f32 0.5, %v111_v43 }
 0x115   :  { %v122_v47 = vmul.f32 %v2013_v41, %v119_v44 }
 0x116   :  { %v113_v48 = vsub.f32 1.5, %v112_v46 }
 0x117   :  { %v125_v49 = vadd.f32 %v2014_v45, %v122_v47 }
 0x118   :  { %v114_v50 = vmul.f32 %v2032_v38, %v113_v48 }
 0x119   :  { %1877 = vmatmul.msk.f32.vlgmr.msra.gmra.mxu0 %vm69_vm0, %v125_v49 }
 0x11a   :  { %v118_v51 = vsel %vm117_vm7, %v2032_v38, %v114_v50 }
 0x11b   :  { %v120_v52 = vmul.f32 %v118_v51, %v86_v18 }
 0x11d   :  { %v123_v53 = vmul.f32 %v2013_v41, %v120_v52 }
 0x11f   :  { %v126_v54 = vadd.f32 %v2014_v45, %v123_v53 }
 0x121   :  { %1878 = vmatmul.msk.f32.gmra.mxu0 %vm69_vm0, %v126_v54 }
 0x196   :  { %v2280_v55 = vpop.f32.mrf.mxu0 }
 0x197   :  { %158 = vrot.lane.b32.xlu2 %v2280_v55, %s2208_s0 }
 0x19e   :  { %v2284_v56 = vpop.f32.mrf.mxu0 }
 0x19f   :  { %162 = vrot.lane.b32.xlu2 %v2280_v55, %s2209_s1  ;;  %168 = vrot.lane.b32.xlu1 %v2284_v56, %s2210_s21 }
 0x1a0   :  { %160 = vrot.lane.b32.xlu0 %v2284_v56, %s2208_s0 }
 0x1a7   :  { %166 = vrot.lane.b32.xlu2 %v2280_v55, %s2210_s21 }
 0x1a8   :  { %170 = vrot.lane.b32.xlu0 %v2280_v55, %s2211_s22 }
 0x1af   :  { %164 = vrot.lane.b32.xlu2 %v2284_v56, %s2209_s1 }
 0x1b7   :  { %197 = vrot.lane.b32.xlu2 %v2284_v56, %s2211_s22 }
 0x1f1   :  { %v2300_v57 = vpop.permute.xlu2 %158 }
 0x1f2   :  { %223 = vrot.lane.b32.xlu2 %v2300_v57, %s2211_s22  ;;  %v1963_v50 = vpack.i.bf16 %v2300_v57, %v2280_v55 }
 0x1f9   :  { %v2304_v58 = vpop.permute.xlu2 %162 }
 0x1fa   :  { %275 = vrot.lane.b32.xlu1 %v2304_v58, %s2211_s22 }
 0x201   :  { %v2308_v59 = vpop.permute.xlu2 %166 }
 0x202   :  { %327 = vrot.lane.b32.xlu1 %v2308_v59, %s2211_s22 }
 0x209   :  { %v2312_v60 = vpop.permute.xlu2 %164 }
 0x211   :  { %v198_v61 = vpop.permute.xlu2 %197  ;;  %v2314_v62 = vpop.permute.xlu1 %168 }
 0x212   :  { %v2316_v63 = vpop.permute.xlu0 %160  ;;  %1881 = vmatpush.xpose.msk.msra.mxu3 %vm172_vm8, %v198_v61  ;;  %353 = vrot.lane.b32.xlu2 %v2314_v62, %s2211_s22 }
 0x213   :  { %249 = vrot.lane.b32.xlu0 %v2316_v63, %s2211_s22 }
 0x215   :  { %1882 = vmatmul.msk.f32.vlgmr.msra.gmra.mxu3 %vm172_vm8, %v2284_v56 }
 0x21a   :  { %v171_v1 = vpop.permute.xlu0 %170 }
 0x21b   :  { %301 = vrot.lane.b32.xlu0 %v2312_v60, %s2211_s22  ;;  %1879 = vmatpush.xpose.msk.msra.mxu1 %vm172_vm8, %v171_v1 }
 0x21e   :  { %1880 = vmatmul.msk.f32.vlgmr.msra.gmra.mxu1 %vm172_vm8, %v2280_v55 }
 0x24c   :  { %v224_v3 = vpop.permute.xlu2 %223 }
 0x24d   :  { %1883 = vmatpush.xpose.msk.msrb.mxu3 %vm172_vm8, %v224_v3 }
 0x250   :  { %1884 = vmatmul.msk.f32.vlgmr.msrb.gmra.mxu3 %vm172_vm8, %v2300_v57 }
 0x26c   :  { %v354_v4 = vpop.permute.xlu2 %353  ;;  %v276_v5 = vpop.permute.xlu1 %275 }
 0x26d   :  { %1887 = vmatpush.xpose.msk.msra.mxu2 %vm172_vm8, %v276_v5 }
 0x270   :  { %1888 = vmatmul.msk.f32.vlgmr.msra.gmra.mxu2 %vm172_vm8, %v2304_v58 }
 0x271   :  { %1893 = vmatpush.xpose.msk.msrb.mxu2 %vm172_vm8, %v354_v4  ;;  %v1973_v4 = vpack.i.bf16 %v2308_v59, %v2284_v56 }
 0x274   :  { %v328_v7 = vpop.permute.xlu1 %327 }
 0x278   :  { %1894 = vmatmul.msk.f32.vlgmr.msrb.gmra.mxu2 %vm172_vm8, %v2314_v62 }
 0x285   :  { %v250_v6 = vpop.permute.xlu0 %249 }
 0x286   :  { %1885 = vmatpush.xpose.msk.msrb.mxu1 %vm172_vm8, %v250_v6 }
 0x289   :  { %1886 = vmatmul.msk.f32.vlgmr.msrb.gmra.mxu1 %vm172_vm8, %v2316_v63 }
 0x28a   :  { %1891 = vmatpush.xpose.msk.msra.mxu1 %vm172_vm8, %v328_v7 }
 0x28d   :  { %v302_v8 = vpop.permute.xlu0 %301 }
 0x28e   :  { %1889 = vmatpush.xpose.msk.msra.mxu3 %vm172_vm8, %v302_v8 }
 0x291   :  { %1890 = vmatmul.msk.f32.vlgmr.msra.gmra.mxu3 %vm172_vm8, %v2312_v60  ;;  %1892 = vmatmul.msk.f32.vlgmr.msra.gmra.mxu1 %vm172_vm8, %v2308_v59 }
 0x298   :  { %v220_v9 = vpop.f32.mrf.mxu3 }
 0x299   :  { %v380_v11 = vmul.f32 0.35355338, %v220_v9 }
 0x29b   :  { %v194_v12 = vpop.f32.mrf.mxu1  ;;  %v390_v13 = vsel %vm172_vm8, %v380_v11, -inf }
 0x29c   :  { %v379_v14 = vmul.f32 0.35355338, %v194_v12  ;;  %391 = vmax.xlane.f32.xlu1 %v390_v13 }
 0x29e   :  { %v387_v15 = vsel %vm172_vm8, %v379_v14, -inf }
 0x29f   :  { %388 = vmax.xlane.f32.xlu2 %v387_v15 }
 0x2d3   :  { %v246_v16 = vpop.f32.mrf.mxu3 }
 0x2d4   :  { %v381_v17 = vmul.f32 0.35355338, %v246_v16 }
 0x2d6   :  { %v393_v18 = vsel %vm172_vm8, %v381_v17, -inf }
 0x2d7   :  { %394 = vmax.xlane.f32.xlu1 %v393_v18 }
 0x2f3   :  { %v298_v19 = vpop.f32.mrf.mxu2 }
 0x2f4   :  { %v383_v20 = vmul.f32 0.35355338, %v298_v19 }
 0x2f6   :  { %v399_v27 = vsel %vm172_vm8, %v383_v20, -inf }
 0x2f7   :  { %400 = vmax.xlane.f32.xlu0 %v399_v27 }
 0x2fb   :  { %v376_v31 = vpop.f32.mrf.mxu2 }
 0x2fc   :  { %v386_v32 = vmul.f32 0.35355338, %v376_v31 }
 0x2fe   :  { %v408_v35 = vsel %vm172_vm8, %v386_v32, -inf }
 0x306   :  { %v272_v28 = vpop.f32.mrf.mxu1 }
 0x307   :  { %v382_v29 = vmul.f32 0.35355338, %v272_v28 }
 0x309   :  { %v396_v30 = vsel %vm172_vm8, %v382_v29, -inf }
 0x30a   :  { %397 = vmax.xlane.f32.xlu2 %v396_v30 }
 0x30e   :  { %v350_v46 = vpop.f32.mrf.mxu1 }
 0x30f   :  { %v392_v33 = vpop.xlane.xlu1 %391  ;;  %v385_v48 = vmul.f32 0.35355338, %v350_v46 }
 0x310   :  { %v412_v34 = vsub.f32 %v380_v11, %v392_v33 }
 0x311   :  { %v405_v49 = vsel %vm172_vm8, %v385_v48, -inf }
 0x312   :  { %v421_v36 = vmul.f32 1.442695, %v412_v34  ;;  %v389_v37 = vpop.xlane.xlu2 %388  ;;  %409 = vmax.xlane.f32.xlu2 %v408_v35 }
 0x313   :  { %v411_v38 = vsub.f32 %v379_v14, %v389_v37 }
 0x314   :  { %v324_v39 = vpop.f32.mrf.mxu3  ;;  %2033 = vpow2.f32 %v421_v36  ;;  %v1968_v36 = vpack.i.bf16 %v2316_v63, %v2304_v58 }
 0x315   :  { %v419_v40 = vmul.f32 1.442695, %v411_v38  ;;  %v384_v41 = vmul.f32 0.35355338, %v324_v39 }
 0x317   :  { %2035 = vpow2.f32 %v419_v40  ;;  %v402_v42 = vsel %vm172_vm8, %v384_v41, -inf }
 0x318   :  { %403 = vmax.xlane.f32.xlu1 %v402_v42 }
 0x31a   :  { %v2355_v43 = vpop.eup %2033 }
 0x31b   :  { %v438_v47 = vsel %vm172_vm8, %v2355_v43, 0.0 }
 0x31d   :  { %v2036_v44 = vpop.eup %2035 }
 0x31e   :  { %v435_v45 = vsel %vm172_vm8, %v2036_v44, 0.0 }
 0x31f   :  { %436 = vadd.xlane.f32.xlu0 %v435_v45 }
 0x320   :  { %439 = vadd.xlane.f32.xlu1 %v438_v47 }
 0x327   :  { %406 = vmax.xlane.f32.xlu0 %v405_v49 }
 0x32a   :  { %1964 = vrot.lane.b32.xlu2 %v1963_v50, %s2212_s23 }
 0x34a   :  { %v395_v51 = vpop.xlane.xlu1 %394 }
 0x34b   :  { %v413_v52 = vsub.f32 %v381_v17, %v395_v51 }
 0x34d   :  { %v423_v53 = vmul.f32 1.442695, %v413_v52 }
 0x34f   :  { %2037 = vpow2.f32 %v423_v53 }
 0x355   :  { %v2038_v54 = vpop.eup %2037 }
 0x356   :  { %v441_v61 = vsel %vm172_vm8, %v2038_v54, 0.0 }
 0x357   :  { %442 = vadd.xlane.f32.xlu2 %v441_v61 }
 0x36a   :  { %v401_v1 = vpop.xlane.xlu0 %400 }
 0x36b   :  { %v415_v3 = vsub.f32 %v383_v20, %v401_v1 }
 0x36d   :  { %v427_v5 = vmul.f32 1.442695, %v415_v3 }
 0x36f   :  { %2039 = vpow2.f32 %v427_v5  ;;  %1974 = vrot.lane.b32.xlu2 %v1973_v4, %s2212_s23 }
 0x375   :  { %v2368_v55 = vpop.eup %2039 }
 0x376   :  { %v447_v57 = vsel %vm172_vm8, %v2368_v55, 0.0 }
 0x377   :  { %605 = vrot.lane.b32.xlu2 %v2312_v60, %s2212_s23  ;;  %448 = vadd.xlane.f32.xlu1 %v447_v57 }
 0x37d   :  { %v398_v6 = vpop.xlane.xlu2 %397 }
 0x37e   :  { %v414_v7 = vsub.f32 %v382_v29, %v398_v6 }
 0x380   :  { %v425_v8 = vmul.f32 1.442695, %v414_v7 }
 0x382   :  { %2041 = vpow2.f32 %v425_v8 }
 0x385   :  { %v410_v9 = vpop.xlane.xlu2 %409 }
 0x386   :  { %v418_v11 = vsub.f32 %v386_v32, %v410_v9 }
 0x388   :  { %v2374_v56 = vpop.eup %2041  ;;  %v433_v59 = vmul.f32 1.442695, %v418_v11 }
 0x389   :  { %v444_v12 = vsel %vm172_vm8, %v2374_v56, 0.0 }
 0x38a   :  { %2043 = vpow2.f32 %v433_v59  ;;  %445 = vadd.xlane.f32.xlu0 %v444_v12 }
 0x38b   :  { %v404_v13 = vpop.xlane.xlu1 %403 }
 0x38c   :  { %v416_v14 = vsub.f32 %v384_v41, %v404_v13 }
 0x38d   :  { %v1965_v15 = vpop.permute.xlu2 %1964 }
 0x38e   :  { %v429_v16 = vmul.f32 1.442695, %v416_v14  ;;  %v1967_v60 = vunpack.i.h.bf16 %v1965_v15  ;;  %v1966_v17 = vunpack.i.l.bf16 %v1965_v15 }
 0x390   :  { %v2378_v18 = vpop.eup %2043  ;;  %2045 = vpow2.f32 %v429_v16  ;;  %496 = vmatpush.msrb.mxu3 %v1966_v17  ;;  %548 = vmatpush.msrb.mxu1 %v1967_v60 }
 0x391   :  { %v456_v19 = vsel %vm172_vm8, %v2378_v18, 0.0 }
 0x392   :  { %457 = vadd.xlane.f32.xlu1 %v456_v19  ;;  %v437_v20 = vpop.xlane.xlu0 %436 }
 0x393   :  { %2047 = vrcp.f32 %v437_v20  ;;  %v440_v37 = vpop.xlane.xlu1 %439 }
 0x396   :  { %v2046_v27 = vpop.eup %2045 }
 0x397   :  { %v450_v29 = vsel %vm172_vm8, %v2046_v27, 0.0 }
 0x399   :  { %v2048_v28 = vpop.eup %2047 }
 0x39a   :  { %v467_v30 = vmul.f32 %v2048_v28, %v2036_v44  ;;  %451 = vadd.xlane.f32.xlu1 %v450_v29  ;;  %v407_v31 = vpop.xlane.xlu0 %406 }
 0x39b   :  { %v417_v32 = vsub.f32 %v385_v48, %v407_v31  ;;  %v2015_v31 = vld [vmem:[#allocation5 + $0x82] ss:$0 sm:$0xff] }
 0x39c   :  { %1895 = vmatmul.msk.f32.vlgmr.msrb.gmra.mxu3 %vm172_vm8, %v467_v30 }
 0x39d   :  { %v431_v33 = vmul.f32 1.442695, %v417_v32 }
 0x39f   :  { %2049 = vpow2.f32 %v431_v33 }
 0x3a0   :  { %2051 = vrcp.f32 %v440_v37 }
 0x3a5   :  { %v2050_v34 = vpop.eup %2049 }
 0x3a6   :  { %v453_v35 = vsel %vm172_vm8, %v2050_v34, 0.0  ;;  %v2052_v39 = vpop.eup %2051 }
 0x3a7   :  { %454 = vadd.xlane.f32.xlu0 %v453_v35  ;;  %v468_v46 = vmul.f32 %v2052_v39, %v2355_v43 }
 0x3b3   :  { %657 = vrot.lane.b32.xlu1 %v2314_v62, %s2212_s23 }
 0x3bb   :  { %1969 = vrot.lane.b32.xlu0 %v1968_v36, %s2212_s23 }
 0x3c3   :  { %1979 = vrot.lane.b32.xlu0 %v1978_v25, %s2213_s24 }
 0x3ca   :  { %v443_v38 = vpop.xlane.xlu2 %442 }
 0x3cb   :  { %2053 = vrcp.f32 %v443_v38  ;;  %1984 = vrot.lane.b32.xlu0 %v1983_v26, %s2213_s24 }
 0x3d1   :  { %v2054_v40 = vpop.eup %2053 }
 0x3d2   :  { %v469_v41 = vmul.f32 %v2054_v40, %v2038_v54  ;;  %v1975_v42 = vpop.permute.xlu2 %1974 }
 0x3d3   :  { %v1977_v44 = vunpack.i.h.bf16 %v1975_v42  ;;  %v1976_v45 = vunpack.i.l.bf16 %v1975_v42 }
 0x3d4   :  { %1897 = vmatmul.msk.f32.vlgmr.msrb.gmra.mxu1 %vm172_vm8, %v469_v41 }
 0x3d5   :  { %522 = vmatpush.msrb.mxu0 %v1976_v45  ;;  %652 = vmatpush.msra.mxu1 %v1977_v44 }
 0x3d6   :  { %1896 = vmatmul.msk.f32.vlgmr.msrb.gmra.mxu0 %vm172_vm8, %v468_v46 }
 0x3da   :  { %v606_v58 = vpop.permute.xlu2 %605 }
 0x3db   :  { %626 = vmatpush.msra.mxu0 %v606_v58 }
 0x3ea   :  { %v449_v62 = vpop.xlane.xlu1 %448 }
 0x3fd   :  { %v446_v47 = vpop.xlane.xlu0 %445 }
 0x405   :  { %v458_v63 = vpop.xlane.xlu1 %457 }
 0x40d   :  { %v452_v43 = vpop.xlane.xlu1 %451 }
 0x40e   :  { %2055 = vrcp.f32 %v452_v43  ;;  %v52_v43 = vld [vmem:[#allocation5 + $0x30] sm:$0xff] }
 0x414   :  { %v2056_v48 = vpop.eup %2055 }
 0x415   :  { %v472_v49 = vmul.f32 %v2056_v48, %v2046_v27  ;;  %v50_v48 = vld [vmem:[#allocation5 + $0x20] sm:$0xff] }
 0x417   :  { %1900 = vmatmul.msk.f32.vlgmr.msra.gmra.mxu0 %vm172_vm8, %v472_v49 }
 0x41a   :  { %v455_v21 = vpop.xlane.xlu0 %454 }
 0x41b   :  { %2057 = vrcp.f32 %v455_v21 }
 0x41c   :  { %2059 = vrcp.f32 %v449_v62 }
 0x41d   :  { %2061 = vrcp.f32 %v446_v47  ;;  %v51_v47 = vld [vmem:[#allocation5 + $0x28] sm:$0xff] }
 0x41e   :  { %2063 = vrcp.f32 %v458_v63  ;;  %v53_v63 = vld [vmem:[#allocation5 + $0x38] sm:$0xff] }
 0x41f   :  { %v498_v9 = vpop.f32.mrf.mxu3  ;;  %832 = vmatpush.msrb.mxu0 %v53_v63 }
 0x421   :  { %v2058_v22 = vpop.eup %2057  ;;  %833 = vmatpush.msrb.mxu0 %v52_v43 }
 0x422   :  { %v473_v25 = vmul.f32 %v2058_v22, %v2050_v34  ;;  %v2060_v50 = vpop.eup %2059 }
 0x423   :  { %v2062_v23 = vpop.eup %2061  ;;  %v471_v52 = vmul.f32 %v2060_v50, %v2368_v55  ;;  %834 = vmatpush.msrb.mxu0 %v51_v47 }
 0x424   :  { %1901 = vmatmul.msk.f32.vlgmr.msra.gmra.mxu1 %vm172_vm8, %v473_v25  ;;  %v470_v53 = vmul.f32 %v2062_v23, %v2374_v56  ;;  %v2064_v61 = vpop.eup %2063 }
 0x425   :  { %v658_v54 = vpop.permute.xlu1 %657  ;;  %v474_v1 = vmul.f32 %v2064_v61, %v2378_v18  ;;  %835 = vmatpush.msrb.mxu0 %v50_v48  ;;  %v2017_v61 = vld [vmem:[#allocation5 + $0x84] ss:$0 sm:$0xff] }
 0x42d   :  { %v1970_v24 = vpop.permute.xlu0 %1969 }
 0x42e   :  { %v1972_v26 = vunpack.i.h.bf16 %v1970_v24  ;;  %v1971_v51 = vunpack.i.l.bf16 %v1970_v24 }
 0x430   :  { %574 = vmatpush.msra.mxu2 %v1972_v26  ;;  %600 = vmatpush.msra.mxu3 %v1971_v51 }
 0x431   :  { %1898 = vmatmul.msk.f32.vlgmr.msra.gmra.mxu2 %vm172_vm8, %v470_v53  ;;  %1899 = vmatmul.msk.f32.vlgmr.msra.gmra.mxu3 %vm172_vm8, %v471_v52  ;;  %v2016_v52 = vld [vmem:[#allocation5 + $0x83] ss:$0 sm:$0xff] }
 0x432   :  { %678 = vmatpush.msrb.mxu2 %v658_v54 }
 0x435   :  { %v1980_v4 = vpop.permute.xlu0 %1979 }
 0x436   :  { %v1982_v5 = vunpack.i.h.bf16 %v1980_v4  ;;  %v1981_v55 = vunpack.i.l.bf16 %v1980_v4 }
 0x438   :  { %750 = vmatpush.msrb.mxu3 %v1981_v55 }
 0x439   :  { %1902 = vmatmul.msk.f32.vlgmr.msrb.gmra.mxu2 %vm172_vm8, %v474_v1 }
 0x43a   :  { %751 = vmatpush.msrb.mxu3 %v1982_v5 }
 0x43d   :  { %v1985_v6 = vpop.permute.xlu0 %1984 }
 0x43e   :  { %v1987_v7 = vunpack.i.h.bf16 %v1985_v6  ;;  %v1986_v8 = vunpack.i.l.bf16 %v1985_v6 }
 0x440   :  { %752 = vmatpush.msrb.mxu3 %v1986_v8 }
 0x442   :  { %753 = vmatpush.msrb.mxu3 %v1987_v7 }
 0x451   :  { %v550_v3 = vpop.f32.mrf.mxu1 }
 0x452   :  { %685 = vrot.lane.b32.xlu2 %v550_v3, %s2205_s18 }
 0x453   :  { %v524_v11 = vpop.f32.mrf.mxu0 }
 0x494   :  { %v628_v12 = vpop.f32.mrf.mxu0 }
 0x4a1   :  { %v654_v57 = vpop.f32.mrf.mxu1 }
 0x4a2   :  { %701 = vrot.lane.b32.xlu0 %v654_v57, %s2214_s25 }
 0x4ac   :  { %v686_v14 = vpop.permute.xlu2 %685 }
 0x4ad   :  { %v707_v16 = vsel %vm172_vm8, %v498_v9, %v686_v14  ;;  %v2018_v14 = vld [vmem:[#allocation5 + $0x85] ss:$0 sm:$0xff] }
 0x4b4   :  { %v576_v56 = vpop.f32.mrf.mxu2  ;;  %v602_v59 = vpop.f32.mrf.mxu3 }
 0x4b5   :  { %687 = vrot.lane.b32.xlu1 %v576_v56, %s2205_s18  ;;  %693 = vrot.lane.b32.xlu2 %v602_v59, %s2215_s26 }
 0x4bc   :  { %v680_v13 = vpop.f32.mrf.mxu2 }
 0x4bd   :  { %703 = vrot.lane.b32.xlu0 %v680_v13, %s2214_s25  ;;  %695 = vrot.lane.b32.xlu2 %v628_v12, %s2215_s26 }
 0x50f   :  { %v694_v15 = vpop.permute.xlu2 %693 }
 0x510   :  { %v710_v60 = vsel %vm709_vm9, %v707_v16, %v694_v15 }
 0x514   :  { %v702_v17 = vpop.permute.xlu0 %701 }
 0x515   :  { %v713_v18 = vsel %vm712_vm10, %v710_v60, %v702_v17 }
 0x516   :  { %1903 = vmatmul.msk.f32.vlgmr.msrb.gmra.mxu3 %vm69_vm0, %v713_v18 }
 0x517   :  { %v696_v27 = vpop.permute.xlu2 %695 }
 0x527   :  { %v688_v19 = vpop.permute.xlu1 %687 }
 0x528   :  { %v708_v20 = vsel %vm172_vm8, %v524_v11, %v688_v19 }
 0x529   :  { %v711_v29 = vsel %vm709_vm9, %v708_v20, %v696_v27  ;;  %v61_v20 = vld [vmem:[#allocation5 + $0x78] sm:$0xff]  ;;  %v60_v27 = vld [vmem:[#allocation5 + $0x70] sm:$0xff] }
 0x52a   :  { %939 = vmatpush.msrb.mxu1 %v61_v20 }
 0x52c   :  { %940 = vmatpush.msrb.mxu1 %v60_v27 }
 0x52f   :  { %v704_v28 = vpop.permute.xlu0 %703 }
 0x530   :  { %v714_v30 = vsel %vm712_vm10, %v711_v29, %v704_v28  ;;  %v59_v28 = vld [vmem:[#allocation5 + $0x68] sm:$0xff]  ;;  %v58_v29 = vld [vmem:[#allocation5 + $0x60] sm:$0xff] }
 0x531   :  { %1904 = vmatmul.msk.f32.gmra.mxu3 %vm69_vm0, %v714_v30  ;;  %941 = vmatpush.msrb.mxu1 %v59_v28 }
 0x533   :  { %942 = vmatpush.msrb.mxu1 %v58_v29 }
 0x599   :  { %v755_v32 = vpop.f32.mrf.mxu3 }
 0x59a   :  { %v756_v33 = vadd.f32 %v2015_v31, %v755_v32  ;;  %v57_v32 = vld [vmem:[#allocation5 + $0x58] sm:$0xff] }
 0x59b   :  { %943 = vmatpush.msrb.mxu1 %v57_v32 }
 0x59c   :  { %v2424_v34 = vadd.f32 %v756_v33, %v2244_v0 }
 0x59e   :  { %v763_v35 = vsel %vm69_vm0, %v2424_v34, 0.0 }
 0x59f   :  { %764 = vadd.xlane.f32.xlu1 %v763_v35  ;;  %v56_v35 = vld [vmem:[#allocation5 + $0x50] sm:$0xff] }
 0x5a0   :  { %944 = vmatpush.msrb.mxu1 %v56_v35 }
 0x5b4   :  { %v758_v36 = vpop.f32.mrf.mxu3 }
 0x5b5   :  { %v759_v37 = vadd.f32 %v2015_v31, %v758_v36 }
 0x5b7   :  { %v2429_v38 = vadd.f32 %v759_v37, %v2248_v2 }
 0x5b9   :  { %v766_v39 = vsel %vm69_vm0, %v2429_v38, 0.0 }
 0x5ba   :  { %767 = vadd.xlane.f32.xlu2 %v766_v39 }
 0x612   :  { %v765_v40 = vpop.xlane.xlu1 %764 }
 0x613   :  { %v769_v41 = vmul.f32 %v765_v40, %v2252_v10  ;;  %v55_v40 = vld [vmem:[#allocation5 + $0x48] sm:$0xff] }
 0x614   :  { %945 = vmatpush.msrb.mxu1 %v55_v40 }
 0x615   :  { %v771_v42 = vsub.f32 %v2424_v34, %v769_v41  ;;  %v54_v41 = vld [vmem:[#allocation5 + $0x40] sm:$0xff] }
 0x616   :  { %946 = vmatpush.msrb.mxu1 %v54_v41  ;;  %v2019_v41 = vld [vmem:[#allocation5 + $0x86] ss:$0 sm:$0xff] }
 0x617   :  { %v773_v0 = vmul.f32 %v771_v42, %v771_v42 }
 0x619   :  { %v775_v44 = vsel %vm69_vm0, %v773_v0, 0.0 }
 0x61a   :  { %776 = vadd.xlane.f32.xlu0 %v775_v44 }
 0x62d   :  { %v768_v45 = vpop.xlane.xlu2 %767 }
 0x62e   :  { %v770_v46 = vmul.f32 %v768_v45, %v2252_v10 }
 0x630   :  { %v772_v58 = vsub.f32 %v2429_v38, %v770_v46 }
 0x632   :  { %v774_v2 = vmul.f32 %v772_v58, %v772_v58 }
 0x634   :  { %v778_v62 = vsel %vm69_vm0, %v774_v2, 0.0 }
 0x635   :  { %779 = vadd.xlane.f32.xlu1 %v778_v62 }
 0x68d   :  { %v777_v49 = vpop.xlane.xlu0 %776 }
 0x68e   :  { %v781_v21 = vmul.f32 %v777_v49, %v2252_v10 }
 0x690   :  { %v783_v22 = vadd.f32 1e-05, %v781_v21 }
 0x692   :  { %2065 = vrsqrt.f32 %v783_v22  ;;  %vm791_vm12 = vweird.f32 %v783_v22 }
 0x698   :  { %v2066_v25 = vpop.eup %2065 }
 0x699   :  { %v786_v50 = vmul.f32 %v2066_v25, %v783_v22  ;;  %vm792_vm11 = vweird.f32 %v2066_v25 }
 0x69a   :  { %vm793_vm13 = vmor %vm791_vm12, %vm792_vm11 }
 0x69b   :  { %v787_v23 = vmul.f32 %v2066_v25, %v786_v50 }
 0x69d   :  { %v788_v24 = vmul.f32 0.5, %v787_v23 }
 0x69f   :  { %v789_v26 = vsub.f32 1.5, %v788_v24 }
 0x6a1   :  { %v790_v51 = vmul.f32 %v2066_v25, %v789_v26 }
 0x6a3   :  { %v794_v53 = vsel %vm793_vm13, %v2066_v25, %v790_v51 }
 0x6a4   :  { %v805_v54 = vmul.f32 %v794_v53, %v771_v42 }
 0x6a6   :  { %v808_v1 = vmul.f32 %v2016_v52, %v805_v54 }
 0x6a8   :  { %v780_v3 = vpop.xlane.xlu1 %779  ;;  %v811_v4 = vadd.f32 %v2017_v61, %v808_v1 }
 0x6a9   :  { %v782_v5 = vmul.f32 %v780_v3, %v2252_v10 }
 0x6aa   :  { %1905 = vmatmul.msk.f32.vlgmr.msrb.gmra.mxu0 %vm69_vm0, %v811_v4 }
 0x6ab   :  { %v784_v55 = vadd.f32 1e-05, %v782_v5 }
 0x6ad   :  { %2067 = vrsqrt.f32 %v784_v55  ;;  %vm801_vm15 = vweird.f32 %v784_v55 }
 0x6b3   :  { %v2068_v57 = vpop.eup %2067 }
 0x6b4   :  { %v796_v6 = vmul.f32 %v2068_v57, %v784_v55  ;;  %vm802_vm14 = vweird.f32 %v2068_v57 }
 0x6b5   :  { %vm803_vm1 = vmor %vm801_vm15, %vm802_vm14  ;;  %vm924_vm14 = vcmask 523264  }
 0x6b6   :  { %v797_v7 = vmul.f32 %v2068_v57, %v796_v6 }
 0x6b8   :  { %v798_v8 = vmul.f32 0.5, %v797_v7 }
 0x6ba   :  { %v799_v9 = vsub.f32 1.5, %v798_v8 }
 0x6bc   :  { %v800_v11 = vmul.f32 %v2068_v57, %v799_v9 }
 0x6be   :  { %v804_v56 = vsel %vm803_vm1, %v2068_v57, %v800_v11 }
 0x6bf   :  { %v806_v59 = vmul.f32 %v804_v56, %v772_v58 }
 0x6c1   :  { %v809_v12 = vmul.f32 %v2016_v52, %v806_v59 }
 0x6c3   :  { %v812_v13 = vadd.f32 %v2017_v61, %v809_v12 }
 0x6c5   :  { %1906 = vmatmul.msk.f32.gmra.mxu0 %vm69_vm0, %v812_v13 }
 0x727   :  { %v837_v15 = vpop.f32.mrf.mxu0 }
 0x728   :  { %v2443_v16 = vadd.f32 %v2018_v14, %v837_v15 }
 0x72a   :  { %v2446_v60 = vmul.f32 0.70710677, %v2443_v16  ;;  %v843_v11 = vmul.f32 0.5, %v2443_v16 }
 0x72c   :  { %v847_v17 = vand.u32 2147483647, %v2446_v60  ;;  %vm913_vm7 = vcmp.lt.f32.partialorder %v2446_v60, 0.0 }
 0x72e   :  { %v849_v18 = vmul.f32 0.3275911, %v847_v17  ;;  %v901_v46 = vsub.f32 0.0, %v847_v17 }
 0x730   :  { %v851_v19 = vadd.f32 1.0, %v849_v18  ;;  %v903_v47 = vmul.f32 %v901_v46, %v847_v17 }
 0x732   :  { %2069 = vrcp.f32 %v851_v19  ;;  %v864_v36 = vand.u32 2147483648, %v851_v19  ;;  %v862_v39 = vand.u32 2147483647, %v851_v19  ;;  %vm858_vm3 = vweird.f32 %v851_v19 }
 0x733   :  { %v905_v25 = vmul.f32 1.442695, %v903_v47 }
 0x734   :  { %v865_v0 = vor.u32 1.1754944e-38, %v864_v36  ;;  %vm863_vm5 = vcmp.eq.f32.partialorder %v862_v39, 8.507059e+37 }
 0x738   :  { %v2070_v30 = vpop.eup %2069 }
 0x739   :  { %v854_v31 = vmul.f32 %v2070_v30, %v851_v19  ;;  %vm859_vm2 = vweird.f32 %v2070_v30 }
 0x73a   :  { %vm860_vm4 = vmor %vm858_vm3, %vm859_vm2 }
 0x73b   :  { %v855_v33 = vsub.f32 1.0, %v854_v31 }
 0x73d   :  { %v856_v37 = vmul.f32 %v2070_v30, %v855_v33 }
 0x73f   :  { %v857_v42 = vadd.f32 %v2070_v30, %v856_v37 }
 0x741   :  { %v861_v44 = vsel %vm860_vm4, %v2070_v30, %v857_v42 }
 0x742   :  { %v866_v45 = vsel %vm863_vm5, %v865_v0, %v861_v44  ;;  %v840_v58 = vpop.f32.mrf.mxu0 }
 0x743   :  { %v883_v2 = vmul.f32 1.0614054, %v866_v45  ;;  %v841_v62 = vadd.f32 %v2018_v14, %v840_v58 }
 0x745   :  { %v1907_v63 = vadd.f32 -1.4531521, %v883_v2  ;;  %v846_v43 = vmul.f32 0.70710677, %v841_v62  ;;  %v844_v37 = vmul.f32 0.5, %v841_v62 }
 0x747   :  { %v887_v48 = vmul.f32 %v1907_v63, %v866_v45  ;;  %v848_v49 = vand.u32 2147483647, %v846_v43  ;;  %vm914_vm15 = vcmp.lt.f32.partialorder %v846_v43, 0.0 }
 0x749   :  { %v889_v21 = vadd.f32 1.4214138, %v887_v48  ;;  %v850_v22 = vmul.f32 0.3275911, %v848_v49  ;;  %v902_v12 = vsub.f32 0.0, %v848_v49 }
 0x74b   :  { %v891_v50 = vmul.f32 %v889_v21, %v866_v45  ;;  %v852_v23 = vadd.f32 1.0, %v850_v22  ;;  %v904_v18 = vmul.f32 %v902_v12, %v848_v49 }
 0x74d   :  { %v1909_v24 = vadd.f32 -0.28449672, %v891_v50  ;;  %2071 = vrcp.f32 %v852_v23  ;;  %v879_v5 = vand.u32 2147483648, %v852_v23  ;;  %v877_v57 = vand.u32 2147483647, %v852_v23  ;;  %v2469_v50 = vld [vmem:[#allocation5 + $0xa0] sm:$0xff] }
 0x74e   :  { %2073 = vpow2.f32 %v905_v25  ;;  %vm873_vm11 = vweird.f32 %v852_v23  ;;  %v907_v20 = vmul.f32 1.442695, %v904_v18  ;;  %1048 = vmatpush.msra.mxu2 %v2469_v50 }
 0x74f   :  { %v895_v26 = vmul.f32 %v1909_v24, %v866_v45  ;;  %v880_v9 = vor.u32 1.1754944e-38, %v879_v5  ;;  %vm878_vm13 = vcmp.eq.f32.partialorder %v877_v57, 8.507059e+37 }
 0x750   :  { %2075 = vpow2.f32 %v907_v20 }
 0x751   :  { %v897_v51 = vadd.f32 0.2548296, %v895_v26  ;;  %v2477_v26 = vld [vmem:[#allocation5 + $0x90] sm:$0xff] }
 0x753   :  { %v2072_v52 = vpop.eup %2071  ;;  %v899_v53 = vmul.f32 %v897_v51, %v866_v45  ;;  %v2480_v51 = vld [vmem:[#allocation5 + $0x88] sm:$0xff] }
 0x754   :  { %v2074_v54 = vpop.eup %2073  ;;  %v869_v61 = vmul.f32 %v2072_v52, %v852_v23  ;;  %vm874_vm6 = vweird.f32 %v2072_v52  ;;  %v2472_v23 = vld [vmem:[#allocation5 + $0x98] sm:$0xff]  ;;  %v2008_v5 = vpack.i.bf16 %v2480_v51, %v2477_v26 }
 0x755   :  { %v909_v1 = vmul.f32 %v2074_v54, %v899_v53  ;;  %vm875_vm12 = vmor %vm873_vm11, %vm874_vm6  ;;  %v2003_v24 = vpack.i.bf16 %v2472_v23, %v2469_v50  ;;  %1049 = vmatpush.msra.mxu2 %v2472_v23 }
 0x756   :  { %v870_v3 = vsub.f32 1.0, %v869_v61  ;;  %v2076_v31 = vpop.eup %2075 }
 0x757   :  { %v911_v4 = vsub.f32 1.0, %v909_v1  ;;  %1050 = vmatpush.msra.mxu2 %v2477_v26 }
 0x758   :  { %v871_v55 = vmul.f32 %v2072_v52, %v870_v3 }
 0x759   :  { %v915_v6 = vsub.f32 0.0, %v911_v4  ;;  %1051 = vmatpush.msra.mxu2 %v2480_v51 }
 0x75a   :  { %v872_v7 = vadd.f32 %v2072_v52, %v871_v55 }
 0x75b   :  { %v917_v8 = vsel %vm913_vm7, %v915_v6, %v911_v4  ;;  %v2020_v6 = vld [vmem:[#allocation5 + $0x108] ss:$0 sm:$0xff] }
 0x75c   :  { %v919_v56 = vadd.f32 1.0, %v917_v8  ;;  %v876_v59 = vsel %vm875_vm12, %v2072_v52, %v872_v7 }
 0x75d   :  { %v881_v13 = vsel %vm878_vm13, %v880_v9, %v876_v59  ;;  %v2021_v9 = vld [vmem:[#allocation5 + $0x109] ss:$0 sm:$0xff] }
 0x75e   :  { %v921_v14 = vmul.f32 %v919_v56, %v843_v11  ;;  %v884_v15 = vmul.f32 1.0614054, %v881_v13 }
 0x760   :  { %1911 = vmatmul.msk.f32.vlgmr.msrb.gmra.mxu1 %vm924_vm14, %v921_v14  ;;  %v1908_v17 = vadd.f32 -1.4531521, %v884_v15 }
 0x762   :  { %v888_v60 = vmul.f32 %v1908_v17, %v881_v13 }
 0x764   :  { %v890_v19 = vadd.f32 1.4214138, %v888_v60 }
 0x766   :  { %v892_v27 = vmul.f32 %v890_v19, %v881_v13 }
 0x768   :  { %v1910_v28 = vadd.f32 -0.28449672, %v892_v27 }
 0x76a   :  { %v896_v29 = vmul.f32 %v1910_v28, %v881_v13 }
 0x76c   :  { %v898_v16 = vadd.f32 0.2548296, %v896_v29 }
 0x76e   :  { %v900_v30 = vmul.f32 %v898_v16, %v881_v13 }
 0x770   :  { %v910_v32 = vmul.f32 %v2076_v31, %v900_v30 }
 0x772   :  { %v912_v33 = vsub.f32 1.0, %v910_v32 }
 0x774   :  { %v916_v35 = vsub.f32 0.0, %v912_v33 }
 0x776   :  { %v918_v36 = vsel %vm914_vm15, %v916_v35, %v912_v33 }
 0x777   :  { %v920_v39 = vadd.f32 1.0, %v918_v36 }
 0x779   :  { %v922_v40 = vmul.f32 %v920_v39, %v844_v37 }
 0x77b   :  { %1912 = vmatmul.msk.f32.gmra.mxu1 %vm924_vm14, %v922_v40 }
 0x7dd   :  { %v948_v42 = vpop.f32.mrf.mxu1 }
 0x7de   :  { %v949_v0 = vadd.f32 %v2019_v41, %v948_v42 }
 0x7e0   :  { %v2454_v44 = vadd.f32 %v949_v0, %v2424_v34 }
 0x7e2   :  { %v980_v45 = vsel %vm69_vm0, %v2454_v44, 0.0 }
 0x7e3   :  { %981 = vadd.xlane.f32.xlu2 %v980_v45 }
 0x7f8   :  { %v951_v46 = vpop.f32.mrf.mxu1 }
 0x7f9   :  { %v952_v58 = vadd.f32 %v2019_v41, %v951_v46 }
 0x7fb   :  { %v2459_v2 = vadd.f32 %v952_v58, %v2429_v38 }
 0x7fd   :  { %v983_v62 = vsel %vm69_vm0, %v2459_v2, 0.0 }
 0x7fe   :  { %984 = vadd.xlane.f32.xlu0 %v983_v62 }
 0x856   :  { %v982_v63 = vpop.xlane.xlu2 %981 }
 0x857   :  { %v986_v43 = vmul.f32 %v982_v63, %v2252_v10 }
 0x859   :  { %v988_v47 = vsub.f32 %v2454_v44, %v986_v43 }
 0x85b   :  { %v990_v34 = vmul.f32 %v988_v47, %v988_v47 }
 0x85d   :  { %v992_v48 = vsel %vm69_vm0, %v990_v34, 0.0 }
 0x85e   :  { %993 = vadd.xlane.f32.xlu1 %v992_v48 }
 0x871   :  { %v985_v49 = vpop.xlane.xlu0 %984 }
 0x872   :  { %v987_v21 = vmul.f32 %v985_v49, %v2252_v10 }
 0x874   :  { %v989_v22 = vsub.f32 %v2459_v2, %v987_v21 }
 0x876   :  { %v991_v38 = vmul.f32 %v989_v22, %v989_v22 }
 0x878   :  { %v995_v25 = vsel %vm69_vm0, %v991_v38, 0.0 }
 0x879   :  { %996 = vadd.xlane.f32.xlu2 %v995_v25 }
 0x8d1   :  { %v994_v52 = vpop.xlane.xlu1 %993 }
 0x8d2   :  { %v998_v53 = vmul.f32 %v994_v52, %v2252_v10 }
 0x8d4   :  { %v1000_v54 = vadd.f32 1e-05, %v998_v53 }
 0x8d6   :  { %2077 = vrsqrt.f32 %v1000_v54  ;;  %vm1008_vm2 = vweird.f32 %v1000_v54 }
 0x8dc   :  { %v2078_v61 = vpop.eup %2077 }
 0x8dd   :  { %v1003_v1 = vmul.f32 %v2078_v61, %v1000_v54  ;;  %vm1009_vm1 = vweird.f32 %v2078_v61 }
 0x8de   :  { %vm1010_vm3 = vmor %vm1008_vm2, %vm1009_vm1 }
 0x8df   :  { %v1004_v3 = vmul.f32 %v2078_v61, %v1003_v1 }
 0x8e1   :  { %v1005_v4 = vmul.f32 0.5, %v1004_v3 }
 0x8e3   :  { %v1006_v55 = vsub.f32 1.5, %v1005_v4 }
 0x8e5   :  { %v1007_v57 = vmul.f32 %v2078_v61, %v1006_v55 }
 0x8e7   :  { %v1011_v7 = vsel %vm1010_vm3, %v2078_v61, %v1007_v57 }
 0x8e8   :  { %v1022_v8 = vmul.f32 %v1011_v7, %v988_v47 }
 0x8ea   :  { %v1025_v11 = vmul.f32 %v2020_v6, %v1022_v8 }
 0x8ec   :  { %v997_v56 = vpop.xlane.xlu2 %996  ;;  %v1028_v59 = vadd.f32 %v2021_v9, %v1025_v11 }
 0x8ed   :  { %v999_v12 = vmul.f32 %v997_v56, %v2252_v10 }
 0x8ee   :  { %1913 = vmatmul.msk.f32.vlgmr.msra.gmra.mxu2 %vm69_vm0, %v1028_v59 }
 0x8ef   :  { %v1001_v13 = vadd.f32 1e-05, %v999_v12 }
 0x8f1   :  { %2079 = vrsqrt.f32 %v1001_v13  ;;  %vm1018_vm5 = vweird.f32 %v1001_v13 }
 0x8f7   :  { %v2080_v14 = vpop.eup %2079 }
 0x8f8   :  { %v1013_v15 = vmul.f32 %v2080_v14, %v1001_v13  ;;  %vm1019_vm4 = vweird.f32 %v2080_v14 }
 0x8f9   :  { %vm1020_vm6 = vmor %vm1018_vm5, %vm1019_vm4 }
 0x8fa   :  { %v1014_v17 = vmul.f32 %v2080_v14, %v1013_v15 }
 0x8fc   :  { %v1015_v18 = vmul.f32 0.5, %v1014_v17 }
 0x8fe   :  { %v1016_v60 = vsub.f32 1.5, %v1015_v18 }
 0x900   :  { %v1017_v19 = vmul.f32 %v2080_v14, %v1016_v60 }
 0x902   :  { %v1021_v20 = vsel %vm1020_vm6, %v2080_v14, %v1017_v19 }
 0x903   :  { %v1023_v27 = vmul.f32 %v1021_v20, %v989_v22 }
 0x905   :  { %v1026_v28 = vmul.f32 %v2020_v6, %v1023_v27 }
 0x907   :  { %v1029_v29 = vadd.f32 %v2021_v9, %v1026_v28 }
 0x909   :  { %1914 = vmatmul.msk.f32.gmra.mxu2 %vm69_vm0, %v1029_v29 }
 0x971   :  { %v2489_v16 = vpop.f32.mrf.mxu2 }
 0x972   :  { %1069 = vrot.lane.b32.xlu2 %v2489_v16, %s2210_s21  ;;  %1061 = vrot.lane.b32.xlu0 %v2489_v16, %s2208_s0 }
 0x97a   :  { %1073 = vrot.lane.b32.xlu2 %v2489_v16, %s2211_s22 }
 0x98c   :  { %v2497_v30 = vpop.f32.mrf.mxu2 }
 0x98d   :  { %1071 = vrot.lane.b32.xlu0 %v2497_v30, %s2210_s21  ;;  %1063 = vrot.lane.b32.xlu1 %v2497_v30, %s2208_s0 }
 0x995   :  { %1067 = vrot.lane.b32.xlu0 %v2497_v30, %s2209_s1  ;;  %1065 = vrot.lane.b32.xlu1 %v2489_v16, %s2209_s1 }
 0x9cc   :  { %v2507_v31 = vpop.permute.xlu2 %1069 }
 0x9cd   :  { %1229 = vrot.lane.b32.xlu2 %v2507_v31, %s2211_s22 }
 0x9d4   :  { %v1074_v32 = vpop.permute.xlu2 %1073 }
 0x9d5   :  { %1915 = vmatpush.xpose.msk.msra.mxu3 %vm172_vm8, %v1074_v32 }
 0x9d8   :  { %1916 = vmatmul.msk.f32.vlgmr.msra.gmra.mxu3 %vm172_vm8, %v2489_v16 }
 0x9e4   :  { %v2514_v33 = vpop.permute.xlu0 %1061 }
 0x9e5   :  { %1125 = vrot.lane.b32.xlu1 %v2514_v33, %s2211_s22  ;;  %v1988_v14 = vpack.i.bf16 %v2489_v16, %v2514_v33 }
 0x9ed   :  { %1099 = vrot.lane.b32.xlu1 %v2497_v30, %s2211_s22 }
 0x9ff   :  { %v2520_v35 = vpop.permute.xlu0 %1071  ;;  %v2522_v36 = vpop.permute.xlu1 %1063 }
 0xa00   :  { %1151 = vrot.lane.b32.xlu0 %v2522_v36, %s2211_s22 }
 0xa07   :  { %v2526_v37 = vpop.permute.xlu0 %1067  ;;  %v2528_v39 = vpop.permute.xlu1 %1065 }
 0xa08   :  { %1203 = vrot.lane.b32.xlu1 %v2526_v37, %s2211_s22  ;;  %1255 = vrot.lane.b32.xlu0 %v2520_v35, %s2211_s22  ;;  %v1998_v15 = vpack.i.bf16 %v2528_v39, %v2497_v30 }
 0xa09   :  { %1177 = vrot.lane.b32.xlu2 %v2528_v39, %s2211_s22 }
 0xa27   :  { %v1230_v41 = vpop.permute.xlu2 %1229 }
 0xa57   :  { %v1126_v40 = vpop.permute.xlu1 %1125 }
 0xa58   :  { %1919 = vmatpush.xpose.msk.msrb.mxu2 %vm172_vm8, %v1126_v40 }
 0xa5b   :  { %v1096_v42 = vpop.f32.mrf.mxu3  ;;  %1920 = vmatmul.msk.f32.vlgmr.msrb.gmra.mxu2 %vm172_vm8, %v2514_v33 }
 0xa5c   :  { %1927 = vmatpush.xpose.msk.msra.mxu2 %vm172_vm8, %v1230_v41  ;;  %v1281_v0 = vmul.f32 0.35355338, %v1096_v42 }
 0xa5e   :  { %v1289_v45 = vsel %vm172_vm8, %v1281_v0, -inf }
 0xa5f   :  { %v1100_v46 = vpop.permute.xlu1 %1099  ;;  %1290 = vmax.xlane.f32.xlu2 %v1289_v45 }
 0xa60   :  { %1917 = vmatpush.xpose.msk.msra.mxu0 %vm172_vm8, %v1100_v46 }
 0xa63   :  { %v1178_v58 = vpop.permute.xlu2 %1177  ;;  %1918 = vmatmul.msk.f32.vlgmr.msra.gmra.mxu0 %vm172_vm8, %v2497_v30  ;;  %1928 = vmatmul.msk.f32.vlgmr.msra.gmra.mxu2 %vm172_vm8, %v2507_v31 }
 0xa64   :  { %1923 = vmatpush.xpose.msk.msrb.mxu0 %vm172_vm8, %v1178_v58 }
 0xa6b   :  { %1924 = vmatmul.msk.f32.vlgmr.msrb.gmra.mxu0 %vm172_vm8, %v2528_v39 }
 0xa72   :  { %v1152_v62 = vpop.permute.xlu0 %1151 }
 0xa73   :  { %1921 = vmatpush.xpose.msk.msrb.mxu3 %vm172_vm8, %v1152_v62 }
 0xa76   :  { %1922 = vmatmul.msk.f32.vlgmr.msrb.gmra.mxu3 %vm172_vm8, %v2522_v36 }
 0xa7a   :  { %v1256_v63 = vpop.permute.xlu0 %1255  ;;  %v1204_v43 = vpop.permute.xlu1 %1203 }
 0xa7b   :  { %1925 = vmatpush.xpose.msk.msra.mxu1 %vm172_vm8, %v1204_v43  ;;  %1929 = vmatpush.xpose.msk.msra.mxu3 %vm172_vm8, %v1256_v63 }
 0xa7e   :  { %1926 = vmatmul.msk.f32.vlgmr.msra.gmra.mxu1 %vm172_vm8, %v2526_v37  ;;  %1930 = vmatmul.msk.f32.vlgmr.msra.gmra.mxu3 %vm172_vm8, %v2520_v35 }
 0xad2   :  { %v1291_v1 = vpop.xlane.xlu2 %1290 }
 0xad3   :  { %v1313_v55 = vsub.f32 %v1281_v0, %v1291_v1 }
 0xad5   :  { %v1321_v9 = vmul.f32 1.442695, %v1313_v55 }
 0xad7   :  { %2081 = vpow2.f32 %v1321_v9 }
 0xadd   :  { %v2565_v12 = vpop.eup %2081 }
 0xade   :  { %v1148_v47 = vpop.f32.mrf.mxu2  ;;  %v1337_v13 = vsel %vm172_vm8, %v2565_v12, 0.0 }
 0xadf   :  { %v1283_v34 = vmul.f32 0.35355338, %v1148_v47 }
 0xae0   :  { %v1122_v48 = vpop.f32.mrf.mxu0 }
 0xae1   :  { %v1282_v49 = vmul.f32 0.35355338, %v1122_v48  ;;  %v1295_v21 = vsel %vm172_vm8, %v1283_v34, -inf }
 0xae2   :  { %1296 = vmax.xlane.f32.xlu0 %v1295_v21 }
 0xae3   :  { %v1292_v22 = vsel %vm172_vm8, %v1282_v49, -inf }
 0xae4   :  { %1293 = vmax.xlane.f32.xlu2 %v1292_v22 }
 0xae6   :  { %v1252_v38 = vpop.f32.mrf.mxu2 }
 0xae7   :  { %v1287_v25 = vmul.f32 0.35355338, %v1252_v38 }
 0xae8   :  { %v1200_v52 = vpop.f32.mrf.mxu0 }
 0xae9   :  { %v1285_v53 = vmul.f32 0.35355338, %v1200_v52  ;;  %v1307_v54 = vsel %vm172_vm8, %v1287_v25, -inf }
 0xaea   :  { %1308 = vmax.xlane.f32.xlu0 %v1307_v54 }
 0xaeb   :  { %v1301_v61 = vsel %vm172_vm8, %v1285_v53, -inf }
 0xaec   :  { %1302 = vmax.xlane.f32.xlu1 %v1301_v61 }
 0xaf9   :  { %v1174_v3 = vpop.f32.mrf.mxu3 }
 0xafa   :  { %v1284_v4 = vmul.f32 0.35355338, %v1174_v3 }
 0xafb   :  { %v1226_v57 = vpop.f32.mrf.mxu1 }
 0xafc   :  { %v1286_v6 = vmul.f32 0.35355338, %v1226_v57  ;;  %v1298_v7 = vsel %vm172_vm8, %v1284_v4, -inf }
 0xafd   :  { %1299 = vmax.xlane.f32.xlu1 %v1298_v7 }
 0xafe   :  { %v1304_v8 = vsel %vm172_vm8, %v1286_v6, -inf }
 0xaff   :  { %1305 = vmax.xlane.f32.xlu2 %v1304_v8 }
 0xb01   :  { %v1278_v11 = vpop.f32.mrf.mxu3 }
 0xb02   :  { %v1288_v56 = vmul.f32 0.35355338, %v1278_v11 }
 0xb04   :  { %v1310_v59 = vsel %vm172_vm8, %v1288_v56, -inf }
 0xb05   :  { %1311 = vmax.xlane.f32.xlu0 %v1310_v59 }
 0xb0d   :  { %1338 = vadd.xlane.f32.xlu0 %v1337_v13 }
 0xb21   :  { %1989 = vrot.lane.b32.xlu0 %v1988_v14, %s2212_s23 }
 0xb29   :  { %1999 = vrot.lane.b32.xlu0 %v1998_v15, %s2212_s23 }
 0xb31   :  { %1507 = vrot.lane.b32.xlu0 %v2526_v37, %s2212_s23 }
 0xb39   :  { %2004 = vrot.lane.b32.xlu0 %v2003_v24, %s2213_s24 }
 0xb41   :  { %2009 = vrot.lane.b32.xlu0 %v2008_v5, %s2213_s24 }
 0xb55   :  { %v1297_v19 = vpop.xlane.xlu0 %1296 }
 0xb56   :  { %v1315_v29 = vsub.f32 %v1283_v34, %v1297_v19 }
 0xb57   :  { %v1294_v17 = vpop.xlane.xlu2 %1293 }
 0xb58   :  { %v1314_v18 = vsub.f32 %v1282_v49, %v1294_v17  ;;  %v1325_v23 = vmul.f32 1.442695, %v1315_v29 }
 0xb5a   :  { %v1323_v60 = vmul.f32 1.442695, %v1314_v18 }
 0xb5c   :  { %2083 = vpow2.f32 %v1323_v60 }
 0xb5d   :  { %v1309_v24 = vpop.xlane.xlu0 %1308 }
 0xb5e   :  { %v1319_v51 = vsub.f32 %v1287_v25, %v1309_v24  ;;  %v1993_v25 = vpack.i.bf16 %v2507_v31, %v2522_v36 }
 0xb5f   :  { %v1303_v20 = vpop.xlane.xlu1 %1302 }
 0xb60   :  { %v1317_v27 = vsub.f32 %v1285_v53, %v1303_v20  ;;  %v1333_v30 = vmul.f32 1.442695, %v1319_v51 }
 0xb62   :  { %v2585_v28 = vpop.eup %2083  ;;  %v1329_v16 = vmul.f32 1.442695, %v1317_v27 }
 0xb63   :  { %v1340_v50 = vsel %vm172_vm8, %v2585_v28, 0.0 }
 0xb64   :  { %2085 = vpow2.f32 %v1329_v16  ;;  %1341 = vadd.xlane.f32.xlu2 %v1340_v50 }
 0xb65   :  { %2087 = vpow2.f32 %v1325_v23 }
 0xb66   :  { %2089 = vpow2.f32 %v1333_v30 }
 0xb6a   :  { %v2086_v26 = vpop.eup %2085 }
 0xb6b   :  { %v1349_v5 = vsel %vm172_vm8, %v2086_v26, 0.0  ;;  %v2088_v32 = vpop.eup %2087 }
 0xb6c   :  { %1350 = vadd.xlane.f32.xlu1 %v1349_v5  ;;  %v1343_v42 = vsel %vm172_vm8, %v2088_v32, 0.0  ;;  %v2591_v45 = vpop.eup %2089 }
 0xb6d   :  { %v1355_v63 = vsel %vm172_vm8, %v2591_v45, 0.0 }
 0xb70   :  { %v1300_v33 = vpop.xlane.xlu1 %1299 }
 0xb71   :  { %v1316_v37 = vsub.f32 %v1284_v4, %v1300_v33 }
 0xb72   :  { %v1306_v39 = vpop.xlane.xlu2 %1305 }
 0xb73   :  { %v1327_v40 = vmul.f32 1.442695, %v1316_v37  ;;  %v1318_v41 = vsub.f32 %v1286_v6, %v1306_v39 }
 0xb74   :  { %1344 = vadd.xlane.f32.xlu1 %v1343_v42 }
 0xb75   :  { %2091 = vpow2.f32 %v1327_v40  ;;  %v1331_v0 = vmul.f32 1.442695, %v1318_v41 }
 0xb77   :  { %2093 = vpow2.f32 %v1331_v0 }
 0xb78   :  { %v1312_v46 = vpop.xlane.xlu0 %1311 }
 0xb79   :  { %v1320_v62 = vsub.f32 %v1288_v56, %v1312_v46 }
 0xb7b   :  { %v2593_v58 = vpop.eup %2091  ;;  %v1335_v47 = vmul.f32 1.442695, %v1320_v62 }
 0xb7c   :  { %1356 = vadd.xlane.f32.xlu1 %v1355_v63  ;;  %v1346_v43 = vsel %vm172_vm8, %v2593_v58, 0.0 }
 0xb7d   :  { %1347 = vadd.xlane.f32.xlu2 %v1346_v43  ;;  %v2094_v34 = vpop.eup %2093  ;;  %2095 = vpow2.f32 %v1335_v47 }
 0xb7e   :  { %v1352_v48 = vsel %vm172_vm8, %v2094_v34, 0.0 }
 0xb80   :  { %v1339_v21 = vpop.xlane.xlu0 %1338 }
 0xb81   :  { %2097 = vrcp.f32 %v1339_v21 }
 0xb83   :  { %v2600_v49 = vpop.eup %2095 }
 0xb84   :  { %v1358_v22 = vsel %vm172_vm8, %v2600_v49, 0.0 }
 0xb85   :  { %1353 = vadd.xlane.f32.xlu2 %v1352_v48 }
 0xb87   :  { %v2098_v38 = vpop.eup %2097 }
 0xb88   :  { %v1369_v61 = vmul.f32 %v2098_v38, %v2565_v12  ;;  %v2022_v38 = vld [vmem:[#allocation5 + $0x10a] ss:$0 sm:$0xff] }
 0xb8d   :  { %1359 = vadd.xlane.f32.xlu2 %v1358_v22 }
 0xb93   :  { %v1990_v52 = vpop.permute.xlu0 %1989 }
 0xb94   :  { %v1992_v53 = vunpack.i.h.bf16 %v1990_v52  ;;  %v1991_v54 = vunpack.i.l.bf16 %v1990_v52 }
 0xb95   :  { %1994 = vrot.lane.b32.xlu1 %v1993_v25, %s2212_s23 }
 0xb96   :  { %1398 = vmatpush.msra.mxu0 %v1992_v53  ;;  %1450 = vmatpush.msrb.mxu2 %v1991_v54 }
 0xb97   :  { %1931 = vmatmul.msk.f32.vlgmr.msra.gmra.mxu0 %vm172_vm8, %v1369_v61 }
 0xb9b   :  { %v2000_v1 = vpop.permute.xlu0 %1999 }
 0xb9c   :  { %v2002_v3 = vunpack.i.h.bf16 %v2000_v1  ;;  %v2001_v4 = vunpack.i.l.bf16 %v2000_v1 }
 0xb9e   :  { %1424 = vmatpush.msrb.mxu1 %v2001_v4  ;;  %1502 = vmatpush.msrb.mxu0 %v2002_v3 }
 0xba3   :  { %v1508_v55 = vpop.permute.xlu0 %1507 }
 0xba4   :  { %1528 = vmatpush.msra.mxu1 %v1508_v55 }
 0xba5   :  { %1559 = vrot.lane.b32.xlu2 %v2520_v35, %s2212_s23 }
 0xbd7   :  { %v1342_v31 = vpop.xlane.xlu2 %1341 }
 0xbd8   :  { %2099 = vrcp.f32 %v1342_v31 }
 0xbde   :  { %v2100_v36 = vpop.eup %2099 }
 0xbdf   :  { %v1370_v57 = vmul.f32 %v2100_v36, %v2585_v28  ;;  %v1351_v6 = vpop.xlane.xlu1 %1350 }
 0xbe0   :  { %2101 = vrcp.f32 %v1351_v6 }
 0xbe1   :  { %1932 = vmatmul.msk.f32.vlgmr.msrb.gmra.mxu1 %vm172_vm8, %v1370_v57 }
 0xbe6   :  { %v2102_v7 = vpop.eup %2101 }
 0xbe7   :  { %v1373_v8 = vmul.f32 %v2102_v7, %v2086_v26  ;;  %v1345_v9 = vpop.xlane.xlu1 %1344  ;;  %v2005_v26 = vpop.permute.xlu0 %2004 }
 0xbe8   :  { %2103 = vrcp.f32 %v1345_v9  ;;  %v2007_v51 = vunpack.i.h.bf16 %v2005_v26  ;;  %v2006_v5 = vunpack.i.l.bf16 %v2005_v26 }
 0xbe9   :  { %1935 = vmatmul.msk.f32.vlgmr.msrb.gmra.mxu0 %vm172_vm8, %v1373_v8 }
 0xbea   :  { %1650 = vmatpush.msra.mxu0 %v2006_v5 }
 0xbec   :  { %1651 = vmatpush.msra.mxu0 %v2007_v51 }
 0xbee   :  { %v2104_v11 = vpop.eup %2103 }
 0xbef   :  { %v1371_v56 = vmul.f32 %v2104_v11, %v2088_v32  ;;  %v1357_v12 = vpop.xlane.xlu1 %1356  ;;  %v2010_v41 = vpop.permute.xlu0 %2009  ;;  %v964_v11 = vld [vmem:[#allocation5 + $0xc0] sm:$0xff] }
 0xbf0   :  { %v1348_v59 = vpop.xlane.xlu2 %1347  ;;  %v2012_v42 = vunpack.i.h.bf16 %v2010_v41  ;;  %v2011_v0 = vunpack.i.l.bf16 %v2010_v41  ;;  %1732 = vmatpush.msrb.mxu1 %v964_v11 }
 0xbf1   :  { %1933 = vmatmul.msk.f32.vlgmr.msrb.gmra.mxu2 %vm172_vm8, %v1371_v56  ;;  %v963_v56 = vld [vmem:[#allocation5 + $0xb8] sm:$0xff] }
 0xbf2   :  { %1652 = vmatpush.msra.mxu0 %v2011_v0  ;;  %1733 = vmatpush.msrb.mxu1 %v963_v56  ;;  %v2025_v0 = vld [vmem:[#allocation5 + $0x10d] ss:$0 sm:$0xff] }
 0xbf4   :  { %1653 = vmatpush.msra.mxu0 %v2012_v42 }
 0xbf8   :  { %v1354_v35 = vpop.xlane.xlu2 %1353 }
 0xbf9   :  { %2105 = vrcp.f32 %v1354_v35  ;;  %v961_v35 = vld [vmem:[#allocation5 + $0xa8] sm:$0xff] }
 0xbfa   :  { %2107 = vrcp.f32 %v1357_v12 }
 0xbfb   :  { %2109 = vrcp.f32 %v1348_v59  ;;  %v962_v59 = vld [vmem:[#allocation5 + $0xb0] sm:$0xff] }
 0xbfc   :  { %1734 = vmatpush.msrb.mxu1 %v962_v59 }
 0xbfe   :  { %1735 = vmatpush.msrb.mxu1 %v961_v35 }
 0xbff   :  { %v2106_v13 = vpop.eup %2105 }
 0xc00   :  { %v1374_v14 = vmul.f32 %v2106_v13, %v2094_v34  ;;  %v1360_v15 = vpop.xlane.xlu2 %1359  ;;  %v2108_v17 = vpop.eup %2107 }
 0xc01   :  { %v2110_v18 = vpop.eup %2109  ;;  %2111 = vrcp.f32 %v1360_v15  ;;  %v1375_v27 = vmul.f32 %v2108_v17, %v2591_v45 }
 0xc02   :  { %1936 = vmatmul.msk.f32.vlgmr.msra.gmra.mxu1 %vm172_vm8, %v1374_v14  ;;  %v1372_v28 = vmul.f32 %v2110_v18, %v2593_v58 }
 0xc07   :  { %v1995_v60 = vpop.permute.xlu1 %1994  ;;  %v2112_v16 = vpop.eup %2111 }
 0xc08   :  { %v1997_v19 = vunpack.i.h.bf16 %v1995_v60  ;;  %v1996_v20 = vunpack.i.l.bf16 %v1995_v60  ;;  %v1560_v29 = vpop.permute.xlu2 %1559  ;;  %v1376_v50 = vmul.f32 %v2112_v16, %v2600_v49 }
 0xc0a   :  { %1476 = vmatpush.msrb.mxu3 %v1996_v20  ;;  %1554 = vmatpush.msra.mxu2 %v1997_v19 }
 0xc0b   :  { %1934 = vmatmul.msk.f32.vlgmr.msrb.gmra.mxu3 %vm172_vm8, %v1372_v28  ;;  %1937 = vmatmul.msk.f32.vlgmr.msra.gmra.mxu2 %vm172_vm8, %v1375_v27 }
 0xc0c   :  { %1580 = vmatpush.msra.mxu3 %v1560_v29  ;;  %v2023_v29 = vld [vmem:[#allocation5 + $0x10b] ss:$0 sm:$0xff] }
 0xc13   :  { %1938 = vmatmul.msk.f32.vlgmr.msra.gmra.mxu3 %vm172_vm8, %v1376_v50 }
 0xc14   :  { %v1400_v23 = vpop.f32.mrf.mxu0 }
 0xc5e   :  { %v1426_v30 = vpop.f32.mrf.mxu1 }
 0xc66   :  { %v1504_v32 = vpop.f32.mrf.mxu0 }
 0xc74   :  { %v1452_v24 = vpop.f32.mrf.mxu2 }
 0xc75   :  { %1587 = vrot.lane.b32.xlu1 %v1452_v24, %s2205_s18  ;;  %v2024_v24 = vld [vmem:[#allocation5 + $0x10c] ss:$0 sm:$0xff] }
 0xc7d   :  { %1595 = vrot.lane.b32.xlu1 %v1504_v32, %s2215_s26 }
 0xc7f   :  { %v1530_v33 = vpop.f32.mrf.mxu1 }
 0xc85   :  { %1597 = vrot.lane.b32.xlu1 %v1530_v33, %s2215_s26 }
 0xc8e   :  { %v1478_v37 = vpop.f32.mrf.mxu3  ;;  %v1556_v39 = vpop.f32.mrf.mxu2 }
 0xc8f   :  { %1603 = vrot.lane.b32.xlu2 %v1556_v39, %s2214_s25  ;;  %1589 = vrot.lane.b32.xlu0 %v1478_v37, %s2205_s18 }
 0xc96   :  { %v1582_v40 = vpop.f32.mrf.mxu3 }
 0xc97   :  { %1605 = vrot.lane.b32.xlu2 %v1582_v40, %s2214_s25 }
 0xce7   :  { %v1588_v45 = vpop.permute.xlu1 %1587 }
 0xce8   :  { %v1609_v46 = vsel %vm172_vm8, %v1400_v23, %v1588_v45 }
 0xce9   :  { %v1604_v62 = vpop.permute.xlu2 %1603 }
 0xcef   :  { %v1596_v58 = vpop.permute.xlu1 %1595 }
 0xcf0   :  { %v1611_v63 = vsel %vm709_vm9, %v1609_v46, %v1596_v58 }
 0xcf1   :  { %v1613_v43 = vsel %vm712_vm10, %v1611_v63, %v1604_v62  ;;  %v1606_v49 = vpop.permute.xlu2 %1605 }
 0xcf2   :  { %1939 = vmatmul.msk.f32.vlgmr.msra.gmra.mxu0 %vm69_vm0, %v1613_v43 }
 0xcf7   :  { %v1598_v34 = vpop.permute.xlu1 %1597 }
 0xd01   :  { %v1590_v47 = vpop.permute.xlu0 %1589 }
 0xd02   :  { %v1610_v48 = vsel %vm172_vm8, %v1426_v30, %v1590_v47  ;;  %v972_v47 = vld [vmem:[#allocation5 + $0x100] sm:$0xff] }
 0xd03   :  { %v1612_v21 = vsel %vm709_vm9, %v1610_v48, %v1598_v34  ;;  %1838 = vmatpush.msrb.mxu2 %v972_v47  ;;  %v971_v34 = vld [vmem:[#allocation5 + $0xf8] sm:$0xff]  ;;  %v970_v48 = vld [vmem:[#allocation5 + $0xf0] sm:$0xff] }
 0xd04   :  { %v1614_v22 = vsel %vm712_vm10, %v1612_v21, %v1606_v49  ;;  %v969_v49 = vld [vmem:[#allocation5 + $0xe8] sm:$0xff] }
 0xd05   :  { %1940 = vmatmul.msk.f32.gmra.mxu0 %vm69_vm0, %v1614_v22  ;;  %1839 = vmatpush.msrb.mxu2 %v971_v34 }
 0xd07   :  { %1840 = vmatpush.msrb.mxu2 %v970_v48 }
 0xd09   :  { %1841 = vmatpush.msrb.mxu2 %v969_v49 }
 0xd6f   :  { %v1655_v25 = vpop.f32.mrf.mxu0 }
 0xd70   :  { %v1656_v52 = vadd.f32 %v2022_v38, %v1655_v25 }
 0xd72   :  { %v2637_v53 = vadd.f32 %v1656_v52, %v2454_v44 }
 0xd74   :  { %v1663_v54 = vsel %vm69_vm0, %v2637_v53, 0.0 }
 0xd75   :  { %1664 = vadd.xlane.f32.xlu0 %v1663_v54 }
 0xd82   :  { %v1658_v61 = vpop.f32.mrf.mxu0 }
 0xd83   :  { %v1659_v1 = vadd.f32 %v2022_v38, %v1658_v61  ;;  %v968_v38 = vld [vmem:[#allocation5 + $0xe0] sm:$0xff]  ;;  %v967_v61 = vld [vmem:[#allocation5 + $0xd8] sm:$0xff] }
 0xd84   :  { %1842 = vmatpush.msrb.mxu2 %v968_v38 }
 0xd85   :  { %v2642_v3 = vadd.f32 %v1659_v1, %v2459_v2 }
 0xd86   :  { %1843 = vmatpush.msrb.mxu2 %v967_v61 }
 0xd87   :  { %v1666_v4 = vsel %vm69_vm0, %v2642_v3, 0.0 }
 0xd88   :  { %1667 = vadd.xlane.f32.xlu1 %v1666_v4 }
 0xde8   :  { %v1665_v55 = vpop.xlane.xlu0 %1664 }
 0xde9   :  { %v1669_v31 = vmul.f32 %v1665_v55, %v2252_v10 }
 0xdeb   :  { %v1671_v36 = vsub.f32 %v2637_v53, %v1669_v31 }
 0xded   :  { %v1673_v44 = vmul.f32 %v1671_v36, %v1671_v36 }
 0xdef   :  { %v1675_v57 = vsel %vm69_vm0, %v1673_v44, 0.0  ;;  %v965_v44 = vld [vmem:[#allocation5 + $0xc8] sm:$0xff] }
 0xdf0   :  { %1676 = vadd.xlane.f32.xlu2 %v1675_v57 }
 0xdfb   :  { %v1668_v6 = vpop.xlane.xlu1 %1667 }
 0xdfc   :  { %v1670_v7 = vmul.f32 %v1668_v6, %v2252_v10 }
 0xdfe   :  { %v1672_v8 = vsub.f32 %v2642_v3, %v1670_v7 }
 0xe00   :  { %v1674_v2 = vmul.f32 %v1672_v8, %v1672_v8 }
 0xe02   :  { %v1678_v9 = vsel %vm69_vm0, %v1674_v2, 0.0 }
 0xe03   :  { %1679 = vadd.xlane.f32.xlu0 %v1678_v9 }
 0xe63   :  { %v1677_v12 = vpop.xlane.xlu2 %1676 }
 0xe64   :  { %v1681_v13 = vmul.f32 %v1677_v12, %v2252_v10 }
 0xe66   :  { %v1683_v14 = vadd.f32 1e-05, %v1681_v13 }
 0xe68   :  { %2113 = vrsqrt.f32 %v1683_v14  ;;  %vm1691_vm9 = vweird.f32 %v1683_v14 }
 0xe6e   :  { %v2114_v15 = vpop.eup %2113 }
 0xe6f   :  { %v1686_v17 = vmul.f32 %v2114_v15, %v1683_v14  ;;  %vm1692_vm8 = vweird.f32 %v2114_v15 }
 0xe70   :  { %vm1693_vm10 = vmor %vm1691_vm9, %vm1692_vm8 }
 0xe71   :  { %v1687_v18 = vmul.f32 %v2114_v15, %v1686_v17 }
 0xe73   :  { %v1688_v60 = vmul.f32 0.5, %v1687_v18 }
 0xe75   :  { %v1689_v19 = vsub.f32 1.5, %v1688_v60 }
 0xe76   :  { %v1680_v20 = vpop.xlane.xlu0 %1679 }
 0xe77   :  { %v1690_v27 = vmul.f32 %v2114_v15, %v1689_v19  ;;  %v1682_v28 = vmul.f32 %v1680_v20, %v2252_v10 }
 0xe79   :  { %v1694_v16 = vsel %vm1693_vm10, %v2114_v15, %v1690_v27  ;;  %v1684_v50 = vadd.f32 1e-05, %v1682_v28 }
 0xe7a   :  { %v1705_v23 = vmul.f32 %v1694_v16, %v1671_v36  ;;  %v966_v36 = vld [vmem:[#allocation5 + $0xd0] sm:$0xff] }
 0xe7b   :  { %2115 = vrsqrt.f32 %v1684_v50  ;;  %vm1701_vm11 = vweird.f32 %v1684_v50  ;;  %1844 = vmatpush.msrb.mxu2 %v966_v36 }
 0xe7c   :  { %v1708_v26 = vmul.f32 %v2023_v29, %v1705_v23 }
 0xe7d   :  { %1845 = vmatpush.msrb.mxu2 %v965_v44 }
 0xe7e   :  { %v1711_v51 = vadd.f32 %v2024_v24, %v1708_v26 }
 0xe80   :  { %1941 = vmatmul.msk.f32.vlgmr.msrb.gmra.mxu1 %vm69_vm0, %v1711_v51 }
 0xe81   :  { %v2116_v5 = vpop.eup %2115 }
 0xe82   :  { %v1696_v30 = vmul.f32 %v2116_v5, %v1684_v50  ;;  %vm1702_vm7 = vweird.f32 %v2116_v5 }
 0xe83   :  { %vm1703_vm12 = vmor %vm1701_vm11, %vm1702_vm7 }
 0xe84   :  { %v1697_v32 = vmul.f32 %v2116_v5, %v1696_v30 }
 0xe86   :  { %v1698_v33 = vmul.f32 0.5, %v1697_v32 }
 0xe88   :  { %v1699_v37 = vsub.f32 1.5, %v1698_v33 }
 0xe8a   :  { %v1700_v39 = vmul.f32 %v2116_v5, %v1699_v37 }
 0xe8c   :  { %v1704_v10 = vsel %vm1703_vm12, %v2116_v5, %v1700_v39 }
 0xe8d   :  { %v1706_v40 = vmul.f32 %v1704_v10, %v1672_v8 }
 0xe8f   :  { %v1709_v41 = vmul.f32 %v2023_v29, %v1706_v40 }
 0xe91   :  { %v1712_v42 = vadd.f32 %v2024_v24, %v1709_v41 }
 0xe93   :  { %1942 = vmatmul.msk.f32.gmra.mxu1 %vm69_vm0, %v1712_v42 }
 0xefd   :  { %v1737_v45 = vpop.f32.mrf.mxu1 }
 0xefe   :  { %v2656_v46 = vadd.f32 %v2025_v0, %v1737_v45 }
 0xf00   :  { %v2659_v58 = vmul.f32 0.70710677, %v2656_v46  ;;  %v1743_v45 = vmul.f32 0.5, %v2656_v46 }
 0xf02   :  { %v1747_v62 = vand.u32 2147483647, %v2659_v58  ;;  %vm1813_vm8 = vcmp.lt.f32.partialorder %v2659_v58, 0.0 }
 0xf04   :  { %v1749_v63 = vmul.f32 0.3275911, %v1747_v62  ;;  %v1801_v11 = vsub.f32 0.0, %v1747_v62 }
 0xf06   :  { %v1751_v43 = vadd.f32 1.0, %v1749_v63  ;;  %v1803_v12 = vmul.f32 %v1801_v11, %v1747_v62 }
 0xf08   :  { %2117 = vrcp.f32 %v1751_v43  ;;  %v1764_v1 = vand.u32 2147483648, %v1751_v43  ;;  %v1762_v55 = vand.u32 2147483647, %v1751_v43  ;;  %vm1758_vm15 = vweird.f32 %v1751_v43 }
 0xf09   :  { %v1805_v15 = vmul.f32 1.442695, %v1803_v12 }
 0xf0a   :  { %v1765_v7 = vor.u32 1.1754944e-38, %v1764_v1  ;;  %vm1763_vm2 = vcmp.eq.f32.partialorder %v1762_v55, 8.507059e+37  ;;  %v2026_v55 = vld [vmem:[#allocation5 + $0x10e] ss:$0 sm:$0xff] }
 0xf0e   :  { %v2118_v21 = vpop.eup %2117 }
 0xf0f   :  { %v1754_v22 = vmul.f32 %v2118_v21, %v1751_v43  ;;  %vm1759_vm13 = vweird.f32 %v2118_v21 }
 0xf10   :  { %v1740_v25 = vpop.f32.mrf.mxu1  ;;  %vm1760_vm1 = vmor %vm1758_vm15, %vm1759_vm13 }
 0xf11   :  { %v1755_v52 = vsub.f32 1.0, %v1754_v22  ;;  %v2662_v54 = vadd.f32 %v2025_v0, %v1740_v25 }
 0xf13   :  { %v1756_v4 = vmul.f32 %v2118_v21, %v1755_v52  ;;  %v2665_v31 = vmul.f32 0.70710677, %v2662_v54  ;;  %v1744_v46 = vmul.f32 0.5, %v2662_v54 }
 0xf15   :  { %v1757_v57 = vadd.f32 %v2118_v21, %v1756_v4  ;;  %v1748_v6 = vand.u32 2147483647, %v2665_v31  ;;  %vm1814_vm9 = vcmp.lt.f32.partialorder %v2665_v31, 0.0 }
 0xf17   :  { %v1761_v8 = vsel %vm1760_vm1, %v2118_v21, %v1757_v57  ;;  %v1750_v2 = vmul.f32 0.3275911, %v1748_v6  ;;  %v1802_v32 = vsub.f32 0.0, %v1748_v6 }
 0xf18   :  { %v1766_v9 = vsel %vm1763_vm2, %v1765_v7, %v1761_v8 }
 0xf19   :  { %v1783_v56 = vmul.f32 1.0614054, %v1766_v9  ;;  %v1752_v59 = vadd.f32 1.0, %v1750_v2  ;;  %v1804_v41 = vmul.f32 %v1802_v32, %v1748_v6 }
 0xf1b   :  { %v1943_v35 = vadd.f32 -1.4531521, %v1783_v56  ;;  %2119 = vrcp.f32 %v1752_v59  ;;  %v1779_v28 = vand.u32 2147483648, %v1752_v59  ;;  %v1777_v16 = vand.u32 2147483647, %v1752_v59 }
 0xf1c   :  { %2121 = vpow2.f32 %v1805_v15  ;;  %vm1773_vm4 = vweird.f32 %v1752_v59  ;;  %v1807_v43 = vmul.f32 1.442695, %v1804_v41 }
 0xf1d   :  { %v1787_v13 = vmul.f32 %v1943_v35, %v1766_v9  ;;  %v1780_v26 = vor.u32 1.1754944e-38, %v1779_v28  ;;  %vm1778_vm6 = vcmp.eq.f32.partialorder %v1777_v16, 8.507059e+37 }
 0xf1e   :  { %2123 = vpow2.f32 %v1807_v43 }
 0xf1f   :  { %v1789_v14 = vadd.f32 1.4214138, %v1787_v13 }
 0xf21   :  { %v2120_v17 = vpop.eup %2119  ;;  %v1791_v18 = vmul.f32 %v1789_v14, %v1766_v9 }
 0xf22   :  { %v1769_v60 = vmul.f32 %v2120_v17, %v1752_v59  ;;  %vm1774_vm3 = vweird.f32 %v2120_v17  ;;  %v2122_v51 = vpop.eup %2121 }
 0xf23   :  { %v1945_v19 = vadd.f32 -0.28449672, %v1791_v18  ;;  %vm1775_vm5 = vmor %vm1773_vm4, %vm1774_vm3 }
 0xf24   :  { %v1770_v20 = vsub.f32 1.0, %v1769_v60  ;;  %v2124_v38 = vpop.eup %2123 }
 0xf25   :  { %v1795_v27 = vmul.f32 %v1945_v19, %v1766_v9 }
 0xf26   :  { %v1771_v29 = vmul.f32 %v2120_v17, %v1770_v20 }
 0xf27   :  { %v1797_v50 = vadd.f32 0.2548296, %v1795_v27 }
 0xf28   :  { %v1772_v23 = vadd.f32 %v2120_v17, %v1771_v29 }
 0xf29   :  { %v1799_v24 = vmul.f32 %v1797_v50, %v1766_v9 }
 0xf2a   :  { %v1776_v5 = vsel %vm1775_vm5, %v2120_v17, %v1772_v23 }
 0xf2b   :  { %v1809_v30 = vmul.f32 %v2122_v51, %v1799_v24  ;;  %v1781_v33 = vsel %vm1778_vm6, %v1780_v26, %v1776_v5 }
 0xf2c   :  { %v1784_v37 = vmul.f32 1.0614054, %v1781_v33 }
 0xf2d   :  { %v1811_v39 = vsub.f32 1.0, %v1809_v30 }
 0xf2e   :  { %v1944_v10 = vadd.f32 -1.4531521, %v1784_v37 }
 0xf2f   :  { %v1815_v40 = vsub.f32 0.0, %v1811_v39 }
 0xf30   :  { %v1788_v42 = vmul.f32 %v1944_v10, %v1781_v33 }
 0xf31   :  { %v1817_v0 = vsel %vm1813_vm8, %v1815_v40, %v1811_v39 }
 0xf32   :  { %v1819_v62 = vadd.f32 1.0, %v1817_v0  ;;  %v1790_v63 = vadd.f32 1.4214138, %v1788_v42 }
 0xf34   :  { %v1821_v47 = vmul.f32 %v1819_v62, %v1743_v45  ;;  %v1792_v34 = vmul.f32 %v1790_v63, %v1781_v33 }
 0xf36   :  { %1947 = vmatmul.msk.f32.vlgmr.msrb.gmra.mxu2 %vm924_vm14, %v1821_v47  ;;  %v1946_v48 = vadd.f32 -0.28449672, %v1792_v34 }
 0xf38   :  { %v1796_v49 = vmul.f32 %v1946_v48, %v1781_v33 }
 0xf3a   :  { %v1798_v21 = vadd.f32 0.2548296, %v1796_v49 }
 0xf3c   :  { %v1800_v22 = vmul.f32 %v1798_v21, %v1781_v33 }
 0xf3e   :  { %v1810_v25 = vmul.f32 %v2124_v38, %v1800_v22 }
 0xf40   :  { %v1812_v52 = vsub.f32 1.0, %v1810_v25 }
 0xf42   :  { %v1816_v58 = vsub.f32 0.0, %v1812_v52 }
 0xf44   :  { %v1818_v61 = vsel %vm1814_vm9, %v1816_v58, %v1812_v52 }
 0xf45   :  { %v1820_v1 = vadd.f32 1.0, %v1818_v61 }
 0xf47   :  { %v1822_v4 = vmul.f32 %v1820_v1, %v1744_v46 }
 0xf49   :  { %1948 = vmatmul.msk.f32.gmra.mxu2 %vm924_vm14, %v1822_v4 }
 0xfb9   :  { %v1847_v36 = vpop.f32.mrf.mxu2 }
 0xfba   :  { %v1848_v44 = vadd.f32 %v2026_v55, %v1847_v36 }
 0xfbc   :  { %v1853_v57 = vadd.f32 %v1848_v44, %v2637_v53 }
 0xfbe   :  { %1855 = vst.msk [vmem:[#allocation7] sm:$0xff] %vm69_vm0, %v1853_v57 }
 0xfcc   :  { %v1850_v6 = vpop.f32.mrf.mxu2 }
 0xfcd   :  { %v1851_v31 = vadd.f32 %v2026_v55, %v1850_v6 }
 0xfcf   :  { %v1854_v54 = vadd.f32 %v1851_v31, %v2642_v3 }
 0xfd1   :  { %1856 = vst.msk [vmem:[#allocation7 + $0x8] sm:$0xff] %vm69_vm0, %v1854_v54 }
 0xfd2   :  { %1869 = dma.vmem_to_hbm [thread:$0]  %s1862_s28, 256, %s1864_s3, [#allocation4], %s2204_s17, %s2204_s17, %s2205_s18  }
 0xfd3   :  { %2201 = dma.done.wait [#allocation4], 256  }
 0xfd4   :  { %2202 = vsyncadd [#allocation4], 4294967040 }
 0xfd5   :  { %1874 = vsyncpa [#allocation3], 1 }
 0xfd6   :  { %1875 = vsyncpa [#allocation6], 1 }
 0xfd7   :  { %1876 = vsyncpa [#allocation4], 1 }

</bundles_post_ra>
